<compile_context>
chip_gen: v7x
topology: tpu7x:2x2x1
jax: 0.10.0
libtpu: 0.0.40
codegen_flags: <defaults>
</compile_context>

<pallas_src>
import functools

import jax
import jax.numpy as jnp
from jax.experimental import pallas as pl
from jax.experimental.pallas import tpu as pltpu


def _sa_kernel(x_ref, wc_ref, bc_ref, o_ref):
    """One fused matmul per grid step.

    x_ref : (C, B, in_dim)  channel-leading so the channel max is a short
                            unrolled elementwise maximum chain (VPU, no XLU).
    wc_ref: (in_dim, cols)  column block of the fused weight Wc.
    bc_ref: (1, cols)       matching block of the fused bias bc.
    o_ref : (B, cols)       lane-dense output slab block.
    """
    C = x_ref.shape[0]
    m = x_ref[0]
    for c in range(1, C):                       # C=4 -> statically unrolled
        m = jnp.maximum(m, x_ref[c])
    o_ref[...] = (
        jnp.dot(m, wc_ref[...], preferred_element_type=jnp.float32)
        + bc_ref[...]
    ).astype(o_ref.dtype)


def prepare_sa_params(w1, b1, w2, b2):
    """One-time algebraic fusion of the two SA linear stages (hoisted out of
    the forward path).

      Stage 1: h[b,j,d] = sum_i m[b,i] w1[i,j,d] + b1[0,j,d]
      Stage 2: o[b,k,d] = sum_j h[b,j,d] w2[j,k,d] + b2[0,k,d]
      =>       o[b,k,d] = sum_i m[b,i] Wc[i,d,k] + bc[0,d,k]
        with   Wc[i,d,k] = sum_j w1[i,j,d] w2[j,k,d]
               bc[0,d,k] = sum_j b1[0,j,d] w2[j,k,d] + b2[0,k,d]

    Packed head-major along output columns:
      wc: (in_dim, num*in_dim)   bc: (1, num*in_dim)
    """
    in_dim, hid, num = w1.shape
    wc = jnp.einsum("ijd,jkd->idk", w1, w2).reshape(in_dim, num * in_dim)
    bc = (jnp.einsum("bjd,jkd->bdk", b1, w2)
          + jnp.transpose(b2, (0, 2, 1))).reshape(1, num * in_dim)
    return wc, bc


def _default_col_blocks():
    """2 on v7x (2 TensorCores share the weight DMA), 1 elsewhere."""
    try:
        kind = jax.devices()[0].device_kind.lower()
    except Exception:
        return 1
    return 2 if "v7" in kind else 1


def sa_forward(x, wc, bc, *, num, col_blocks=None):
    """x: (B, C, H, W); wc/bc from prepare_sa_params().
    Returns PyTorch-layout output (B, in_dim, num)."""
    B, C, H, W = x.shape
    in_dim = H * W
    total_cols = wc.shape[1]
    assert total_cols == num * in_dim

    if col_blocks is None:
        col_blocks = _default_col_blocks()
    if total_cols % (col_blocks * 128) != 0:
        col_blocks = 1
    cols = total_cols // col_blocks

    # Channel-leading layout keeps the in-kernel channel max elementwise (VPU).
    x_cbl = jnp.transpose(x.reshape(B, C, in_dim), (1, 0, 2))

    cost = pl.CostEstimate(
        flops=2 * B * in_dim * total_cols,
        transcendentals=0,
        bytes_accessed=4 * (wc.size + bc.size + x.size + B * total_cols),
    )

    out_slab = pl.pallas_call(
        _sa_kernel,
        out_shape=jax.ShapeDtypeStruct((B, total_cols), x.dtype),
        grid_spec=pltpu.PrefetchScalarGridSpec(
            num_scalar_prefetch=0,
            grid=(col_blocks,),
            in_specs=[
                pl.BlockSpec((C, B, in_dim), lambda i: (0, 0, 0)),   # x (CBL)
                pl.BlockSpec((in_dim, cols), lambda i: (0, i)),      # Wc block
                pl.BlockSpec((1, cols), lambda i: (0, i)),           # bc block
            ],
            out_specs=pl.BlockSpec((B, cols), lambda i: (0, i)),
        ),
        compiler_params=pltpu.CompilerParams(
            dimension_semantics=("parallel",),
        ),
        cost_estimate=cost,
    )(x_cbl, wc, bc)

    # (B, num*in_dim) -> PyTorch layout (B, in_dim, num). Lane-sparse transpose
    # done once in the wrapper; drop it if downstream consumes the flat slab.
    return jnp.transpose(out_slab.reshape(B, num, in_dim), (0, 2, 1))


def _sa_reference(x, w1, b1, w2, b2):
    B, C, H, W = x.shape
    mask = jnp.max(x, axis=1).reshape(B, H * W)
    mask = jnp.einsum("bi,ijd->bjd", mask, w1) + b1
    mask = jnp.einsum("bjd,jid->bid", mask, w2) + b2
    return mask


def init_sa_params(key, in_dim, num=8):
    hid_dim = in_dim // 2
    k1, k2 = jax.random.split(key)
    # nn.init.normal_(std=0.005) / nn.init.constant_(0.1)
    w1 = 0.005 * jax.random.normal(k1, (in_dim, hid_dim, num), jnp.float32)
    b1 = jnp.full((1, hid_dim, num), 0.1, jnp.float32)
    w2 = 0.005 * jax.random.normal(k2, (hid_dim, in_dim, num), jnp.float32)
    b2 = jnp.full((1, in_dim, num), 0.1, jnp.float32)
    return w1, b1, w2, b2


if __name__ == "__main__":
    B, C, H, W = 2, 4, 16, 16
    in_dim = H * W            # 256
    num = 8

    key = jax.random.PRNGKey(0)
    kx, kp = jax.random.split(key)
    x = jax.random.normal(kx, (B, C, H, W), jnp.float32)
    w1, b1, w2, b2 = init_sa_params(kp, in_dim, num)

    # One-time fused-parameter precompute (off the forward path).
    wc, bc = prepare_sa_params(w1, b1, w2, b2)
    wc = jax.block_until_ready(wc)
    bc = jax.block_until_ready(bc)

    fwd = jax.jit(functools.partial(sa_forward, num=num))
    out = jax.block_until_ready(fwd(x, wc, bc))

    ref = _sa_reference(x, w1, b1, w2, b2)
    assert out.shape == (B, in_dim, num), out.shape
    assert jnp.allclose(out, ref, atol=1e-5, rtol=1e-5), \
        float(jnp.max(jnp.abs(out - ref)))

    print("KERNEL_OK")
</pallas_src>

<mosaic_0001>
module attributes {stable_mosaic.version = 11 : i64} {
  func.func @_sa_kernel(%arg0: i32, %arg1: memref<4x2x256xf32, #tpu.memory_space<vmem>>, %arg2: memref<256x2048xf32, #tpu.memory_space<vmem>>, %arg3: memref<1x2048xf32, #tpu.memory_space<vmem>>, %arg4: memref<2x2048xf32, #tpu.memory_space<vmem>>) attributes {dimension_semantics = [#tpu.dimension_semantics<parallel>], iteration_bounds = array<i64: 1>, scalar_prefetch = 0 : i64, scratch_operands = 0 : i64, tpu.core_type = #tpu.core_type<tc>, window_params = [{pipeline_mode = #tpu.pipeline_mode<synchronous>, transform_indices = @transform_0, window_bounds = array<i64: 4, 2, 256>}, {transform_indices = @transform_1, window_bounds = array<i64: 256, 2048>}, {transform_indices = @transform_2, window_bounds = array<i64: 1, 2048>}, {transform_indices = @transform_3, window_bounds = array<i64: 2, 2048>}]} {
    %c0 = arith.constant 0 : index
    %c0_0 = arith.constant 0 : index
    %c0_1 = arith.constant 0 : index
    %0 = vector.load %arg1[%c0, %c0_0, %c0_1] : memref<4x2x256xf32, #tpu.memory_space<vmem>>, vector<1x2x256xf32>
    %1 = vector.shape_cast %0 : vector<1x2x256xf32> to vector<2x256xf32>
    %c1 = arith.constant 1 : index
    %c0_2 = arith.constant 0 : index
    %c0_3 = arith.constant 0 : index
    %2 = vector.load %arg1[%c1, %c0_2, %c0_3] : memref<4x2x256xf32, #tpu.memory_space<vmem>>, vector<1x2x256xf32>
    %3 = vector.shape_cast %2 : vector<1x2x256xf32> to vector<2x256xf32>
    %4 = arith.maximumf %1, %3 : vector<2x256xf32>
    %c2 = arith.constant 2 : index
    %c0_4 = arith.constant 0 : index
    %c0_5 = arith.constant 0 : index
    %5 = vector.load %arg1[%c2, %c0_4, %c0_5] : memref<4x2x256xf32, #tpu.memory_space<vmem>>, vector<1x2x256xf32>
    %6 = vector.shape_cast %5 : vector<1x2x256xf32> to vector<2x256xf32>
    %7 = arith.maximumf %4, %6 : vector<2x256xf32>
    %c3 = arith.constant 3 : index
    %c0_6 = arith.constant 0 : index
    %c0_7 = arith.constant 0 : index
    %8 = vector.load %arg1[%c3, %c0_6, %c0_7] : memref<4x2x256xf32, #tpu.memory_space<vmem>>, vector<1x2x256xf32>
    %9 = vector.shape_cast %8 : vector<1x2x256xf32> to vector<2x256xf32>
    %10 = arith.maximumf %7, %9 : vector<2x256xf32>
    %c0_8 = arith.constant 0 : index
    %c0_9 = arith.constant 0 : index
    %11 = vector.load %arg2[%c0_8, %c0_9] : memref<256x2048xf32, #tpu.memory_space<vmem>>, vector<256x2048xf32>
    %cst = arith.constant dense<0.000000e+00> : vector<2x2048xf32>
    %12 = tpu.matmul %10, %11, %cst {dimension_numbers = #tpu.dot_dimension_numbers<[1], [0], [0], [1], [0, 0, 1, 1], [], []>} : vector<2x256xf32>, vector<256x2048xf32>, vector<2x2048xf32> -> vector<2x2048xf32>
    %c0_10 = arith.constant 0 : index
    %c0_11 = arith.constant 0 : index
    %13 = vector.load %arg3[%c0_10, %c0_11] : memref<1x2048xf32, #tpu.memory_space<vmem>>, vector<1x2048xf32>
    %14 = vector.broadcast %13 : vector<1x2048xf32> to vector<2x2048xf32>
    %15 = arith.addf %12, %14 : vector<2x2048xf32>
    %c0_12 = arith.constant 0 : index
    %c0_13 = arith.constant 0 : index
    %16 = vector.load %arg4[%c0_12, %c0_13] : memref<2x2048xf32, #tpu.memory_space<vmem>>, vector<2x2048xf32>
    tpu.vector_store %arg4[%c0_12, %c0_13], %15 {strides = array<i32>} : memref<2x2048xf32, #tpu.memory_space<vmem>>, vector<2x2048xf32>,
    return
  }
  func.func @transform_0(%arg0: i32) -> (i32, i32, i32) {
    %c0_i32 = arith.constant 0 : i32
    %c0_i32_0 = arith.constant 0 : i32
    %c0_i32_1 = arith.constant 0 : i32
    %c0_i32_2 = arith.constant 0 : i32
    return %c0_i32, %c0_i32_0, %c0_i32_1 : i32, i32, i32
  }
  func.func @transform_1(%arg0: i32) -> (i32, i32) {
    %c0_i32 = arith.constant 0 : i32
    %c0_i32_0 = arith.constant 0 : i32
    return %c0_i32, %arg0 : i32, i32
  }
  func.func @transform_2(%arg0: i32) -> (i32, i32) {
    %c0_i32 = arith.constant 0 : i32
    %c0_i32_0 = arith.constant 0 : i32
    return %c0_i32, %arg0 : i32, i32
  }
  func.func @transform_3(%arg0: i32) -> (i32, i32) {
    %c0_i32 = arith.constant 0 : i32
    %c0_i32_0 = arith.constant 0 : i32
    return %c0_i32, %arg0 : i32, i32
  }
}

</mosaic_0001>

<bundles_post_ra>
// kernel: sa_forward.1
= control target key start
LH: loop header
LB: loop body
LE: loop exit
PB: predicated region body
PF: predicated region fallthrough
CT: control target
= control target key end

     0   :  { %8 = vsyncpa [#allocation3], 0  ;;  %s2008_s0 = inlined_call_operand.vmem [shape: f32[4,2,256], index: 0, kind: input, shape index: {}]   ;;  %s2009_s1 = inlined_call_operand.hbm [shape: f32[256,2048], index: 1, kind: input, shape index: {}]   ;;  %s2010_s2 = inlined_call_operand.hbm [shape: f32[1,2048], index: 2, kind: input, shape index: {}]   ;;  %s2011_s3 = inlined_call_operand.vmem [shape: f32[2,2048], index: 3, kind: output, shape index: {}]  }
   0x1   :  { %9 = vsyncpa [#allocation5], 0  ;;  %s1891_s12 = smov [#allocation2]   ;;  %s1843_s16 = scalar_lea.hbm %s2009_s1, 65536 }
   0x2   :  { %s17_s13 = sshll.u32 %s1891_s12, 4  ;;  %p1844_p0 = scmp.ne.s32.totalorder %s2009_s1, %s1843_s16  ;;  %s18_s13 = int_to_ptr.vmem [resolvable:$true] %s17_s13 }
   0x3   :  { %p1847_p1 = scmp.lt.u32.totalorder %s1843_s16, %s2009_s1 }
   0x5   :  { %p1849_p2 = pnand %p1847_p1, %p1844_p0 }
   0x7   :  { %1852 = shalt.err (!%p1849_p2)
}
   0x8   :  { %s1853_s21 = scalar_lea.vmem %s18_s13, 65536  ;;  %p1858_p4 = scmp.lt.s32.totalorder %s18_s13, %s18_s13 }
   0x9   :  { %p1854_p3 = scmp.ne.s32.totalorder %s18_s13, %s1853_s21  ;;  %p1859_p5 = scmp.lt.s32.totalorder %s1853_s21, %s1853_s21 }
   0xb   :  { %p1860_p6 = por %p1859_p5, %p1858_p4 }
   0xd   :  { %p1861_p7 = pnand %p1860_p6, %p1854_p3 }
   0xf   :  { %1864 = shalt.err (!%p1861_p7)
}
  0x10   :  { %s1892_s22 = smov 2048   ;;  %s1893_s23 = smov 128  }
  0x11   :  { %23 = dma.hbm_to_vmem [thread:$0]  %s2009_s1, 65536, %s18_s13, [#allocation3], %s1892_s22, %s1892_s22, %s1893_s23  }
  0x12   :  { %s1894_s26 = smov [#allocation4]   ;;  %s1865_s30 = scalar_lea.hbm %s2010_s2, 256 }
  0x13   :  { %s30_s27 = sshll.u32 %s1894_s26, 4  ;;  %p1866_p8 = scmp.ne.s32.totalorder %s2010_s2, %s1865_s30  ;;  %s31_s27 = int_to_ptr.vmem [resolvable:$true] %s30_s27 }
  0x14   :  { %p1869_p9 = scmp.lt.u32.totalorder %s1865_s30, %s2010_s2 }
  0x16   :  { %p1871_p10 = pnand %p1869_p9, %p1866_p8 }
  0x18   :  { %1874 = shalt.err (!%p1871_p10)
}
  0x19   :  { %s1875_s8 = scalar_lea.vmem %s31_s27, 256  ;;  %p1880_p12 = scmp.lt.s32.totalorder %s31_s27, %s31_s27 }
  0x1a   :  { %p1876_p11 = scmp.ne.s32.totalorder %s31_s27, %s1875_s8  ;;  %p1881_p13 = scmp.lt.s32.totalorder %s1875_s8, %s1875_s8 }
  0x1c   :  { %p1882_p0 = por %p1881_p13, %p1880_p12 }
  0x1e   :  { %p1883_p1 = pnand %p1882_p0, %p1876_p11 }
  0x20   :  { %1886 = shalt.err (!%p1883_p1)
}
  0x21   :  { %33 = dma.hbm_to_vmem [thread:$0]  %s2010_s2, 256, %s31_s27, [#allocation5]  }
  0x22   :  { %1887 = dma.done.wait [#allocation3], 65536  }
  0x23   :  { %1888 = vsyncadd [#allocation3], 4294901760 }
  0x24   :  { %1889 = dma.done.wait [#allocation5], 256  }
  0x25   :  { %1890 = vsyncadd [#allocation5], 4294967040  ;;  %v51_v0 = vld [vmem:[#allocation2 + $0x8] sm:$0xff]  ;;  %v53_v2 = vld [vmem:[#allocation2 + $0x18] sm:$0xff] }
  0x26   :  { %v67_v1 = vld [vmem:[#allocation2 + $0x88] sm:$0xff]  ;;  %v69_v4 = vld [vmem:[#allocation2 + $0x98] sm:$0xff]  ;;  %v50_v5 = vld [vmem:[#allocation2] sm:$0xff] }
  0x27   :  { %v1326_v3 = vpack.c.bf16 %v67_v1, %v51_v0  ;;  %v66_v6 = vld [vmem:[#allocation2 + $0x80] sm:$0xff]  ;;  %v1390_v7 = vpack.c.bf16 %v69_v4, %v53_v2  ;;  %v52_v9 = vld [vmem:[#allocation2 + $0x10] sm:$0xff]  ;;  %v83_v11 = vld [vmem:[#allocation2 + $0x108] sm:$0xff] }
  0x28   :  { %v1328_v8 = vpack.c.bf16 %v66_v6, %v50_v5  ;;  %v68_v10 = vld [vmem:[#allocation2 + $0x90] sm:$0xff]  ;;  %v99_v13 = vld [vmem:[#allocation2 + $0x188] sm:$0xff]  ;;  %v85_v14 = vld [vmem:[#allocation2 + $0x118] sm:$0xff] }
  0x29   :  { %1327 = vmatprep.subr.bf16.mxu0 %v1326_v3  ;;  %v1392_v12 = vpack.c.bf16 %v68_v10, %v52_v9  ;;  %v101_v15 = vld [vmem:[#allocation2 + $0x198] sm:$0xff]  ;;  %1391 = vmatprep.subr.bf16.mxu1 %v1390_v7  ;;  %v1330_v16 = vpack.c.bf16 %v99_v13, %v83_v11  ;;  %v82_v18 = vld [vmem:[#allocation2 + $0x100] sm:$0xff]  ;;  %v84_v20 = vld [vmem:[#allocation2 + $0x110] sm:$0xff] }
  0x2a   :  { %1329 = vmatpush1.bf16.msra.mxu0 %v1328_v8  ;;  %v1394_v17 = vpack.c.bf16 %v101_v15, %v85_v14  ;;  %v98_v19 = vld [vmem:[#allocation2 + $0x180] sm:$0xff]  ;;  %v100_v22 = vld [vmem:[#allocation2 + $0x190] sm:$0xff]  ;;  %v115_v23 = vld [vmem:[#allocation2 + $0x208] sm:$0xff] }
  0x2b   :  { %1393 = vmatpush1.bf16.msra.mxu1 %v1392_v12  ;;  %v1332_v21 = vpack.c.bf16 %v98_v19, %v82_v18  ;;  %v131_v24 = vld [vmem:[#allocation2 + $0x288] sm:$0xff]  ;;  %1331 = vmatprep.subr.bf16.mxu0 %v1330_v16  ;;  %v1396_v25 = vpack.c.bf16 %v100_v22, %v84_v20  ;;  %v117_v27 = vld [vmem:[#allocation2 + $0x218] sm:$0xff]  ;;  %v114_v29 = vld [vmem:[#allocation2 + $0x200] sm:$0xff] }
  0x2c   :  { %1395 = vmatprep.subr.bf16.mxu1 %v1394_v17  ;;  %v1334_v26 = vpack.c.bf16 %v131_v24, %v115_v23  ;;  %v133_v28 = vld [vmem:[#allocation2 + $0x298] sm:$0xff]  ;;  %v130_v31 = vld [vmem:[#allocation2 + $0x280] sm:$0xff]  ;;  %v116_v32 = vld [vmem:[#allocation2 + $0x210] sm:$0xff] }
  0x2d   :  { %v1398_v30 = vpack.c.bf16 %v133_v28, %v117_v27  ;;  %v132_v33 = vld [vmem:[#allocation2 + $0x290] sm:$0xff]  ;;  %v1336_v34 = vpack.c.bf16 %v130_v31, %v114_v29  ;;  %v147_v35 = vld [vmem:[#allocation2 + $0x308] sm:$0xff]  ;;  %v149_v37 = vld [vmem:[#allocation2 + $0x318] sm:$0xff] }
  0x2e   :  { %1333 = vmatpush1.bf16.msra.mxu0 %v1332_v21  ;;  %v163_v36 = vld [vmem:[#allocation2 + $0x388] sm:$0xff]  ;;  %v1400_v38 = vpack.c.bf16 %v132_v33, %v116_v32  ;;  %v165_v40 = vld [vmem:[#allocation2 + $0x398] sm:$0xff]  ;;  %v146_v41 = vld [vmem:[#allocation2 + $0x300] sm:$0xff] }
  0x2f   :  { %1397 = vmatpush1.bf16.msra.mxu1 %v1396_v25  ;;  %1335 = vmatprep.subr.bf16.mxu0 %v1334_v26  ;;  %v1338_v39 = vpack.c.bf16 %v163_v36, %v147_v35  ;;  %v162_v42 = vld [vmem:[#allocation2 + $0x380] sm:$0xff]  ;;  %v1402_v43 = vpack.c.bf16 %v165_v40, %v149_v37  ;;  %v148_v44 = vld [vmem:[#allocation2 + $0x310] sm:$0xff]  ;;  %v179_v46 = vld [vmem:[#allocation2 + $0x408] sm:$0xff] }
  0x30   :  { %1399 = vmatprep.subr.bf16.mxu1 %v1398_v30  ;;  %v164_v45 = vld [vmem:[#allocation2 + $0x390] sm:$0xff]  ;;  %v195_v47 = vld [vmem:[#allocation2 + $0x488] sm:$0xff]  ;;  %v181_v48 = vld [vmem:[#allocation2 + $0x418] sm:$0xff]  ;;  %v1340_v50 = vpack.c.bf16 %v162_v42, %v146_v41 }
  0x31   :  { %v197_v49 = vld [vmem:[#allocation2 + $0x498] sm:$0xff]  ;;  %v1404_v51 = vpack.c.bf16 %v164_v45, %v148_v44  ;;  %v1342_v52 = vpack.c.bf16 %v195_v47, %v179_v46  ;;  %v178_v53 = vld [vmem:[#allocation2 + $0x400] sm:$0xff]  ;;  %v180_v55 = vld [vmem:[#allocation2 + $0x410] sm:$0xff] }
  0x32   :  { %1337 = vmatpush1.bf16.msra.mxu0 %v1336_v34  ;;  %v194_v54 = vld [vmem:[#allocation2 + $0x480] sm:$0xff]  ;;  %v1406_v56 = vpack.c.bf16 %v197_v49, %v181_v48  ;;  %v196_v57 = vld [vmem:[#allocation2 + $0x490] sm:$0xff]  ;;  %v211_v58 = vld [vmem:[#allocation2 + $0x508] sm:$0xff] }
  0x33   :  { %1401 = vmatpush1.bf16.msra.mxu1 %v1400_v38  ;;  %1339 = vmatprep.subr.bf16.mxu0 %v1338_v39  ;;  %v227_v59 = vld [vmem:[#allocation2 + $0x588] sm:$0xff]  ;;  %v213_v60 = vld [vmem:[#allocation2 + $0x518] sm:$0xff]  ;;  %v1344_v62 = vpack.c.bf16 %v194_v54, %v178_v53  ;;  %v1408_v63 = vpack.c.bf16 %v196_v57, %v180_v55  ;;  %v210_v1 = vld [vmem:[#allocation2 + $0x500] sm:$0xff] }
  0x34   :  { %1403 = vmatprep.subr.bf16.mxu1 %v1402_v43  ;;  %v229_v61 = vld [vmem:[#allocation2 + $0x598] sm:$0xff]  ;;  %v1346_v0 = vpack.c.bf16 %v227_v59, %v211_v58  ;;  %v226_v2 = vld [vmem:[#allocation2 + $0x580] sm:$0xff]  ;;  %v212_v3 = vld [vmem:[#allocation2 + $0x510] sm:$0xff] }
  0x35   :  { %v1410_v4 = vpack.c.bf16 %v229_v61, %v213_v60  ;;  %v228_v5 = vld [vmem:[#allocation2 + $0x590] sm:$0xff]  ;;  %v243_v6 = vld [vmem:[#allocation2 + $0x608] sm:$0xff]  ;;  %v245_v8 = vld [vmem:[#allocation2 + $0x618] sm:$0xff]  ;;  %v1348_v10 = vpack.c.bf16 %v226_v2, %v210_v1 }
  0x36   :  { %1341 = vmatpush1.bf16.msra.mxu0 %v1340_v50  ;;  %v259_v7 = vld [vmem:[#allocation2 + $0x688] sm:$0xff]  ;;  %v261_v9 = vld [vmem:[#allocation2 + $0x698] sm:$0xff]  ;;  %v1412_v11 = vpack.c.bf16 %v228_v5, %v212_v3  ;;  %v242_v13 = vld [vmem:[#allocation2 + $0x600] sm:$0xff]  ;;  %v1895_v5 = vmov 1983009808  }
  0x37   :  { %1405 = vmatpush1.bf16.msra.mxu1 %v1404_v51  ;;  %1343 = vmatprep.subr.bf16.mxu0 %v1342_v52  ;;  %v1350_v12 = vpack.c.bf16 %v259_v7, %v243_v6  ;;  %v258_v14 = vld [vmem:[#allocation2 + $0x680] sm:$0xff]  ;;  %v244_v15 = vld [vmem:[#allocation2 + $0x610] sm:$0xff]  ;;  %v1414_v16 = vpack.c.bf16 %v261_v9, %v245_v8  ;;  %v275_v18 = vld [vmem:[#allocation2 + $0x708] sm:$0xff]  ;;  %v648_v6 = vunpack.c.l.s4 %v1895_v5 }
  0x38   :  { %1407 = vmatprep.subr.bf16.mxu1 %v1406_v56  ;;  %v260_v17 = vld [vmem:[#allocation2 + $0x690] sm:$0xff]  ;;  %v291_v19 = vld [vmem:[#allocation2 + $0x788] sm:$0xff]  ;;  %v277_v20 = vld [vmem:[#allocation2 + $0x718] sm:$0xff]  ;;  %v1352_v22 = vpack.c.bf16 %v258_v14, %v242_v13 }
  0x39   :  { %v293_v21 = vld [vmem:[#allocation2 + $0x798] sm:$0xff]  ;;  %v1416_v23 = vpack.c.bf16 %v260_v17, %v244_v15  ;;  %v1354_v24 = vpack.c.bf16 %v291_v19, %v275_v18  ;;  %v274_v25 = vld [vmem:[#allocation2 + $0x700] sm:$0xff]  ;;  %v276_v27 = vld [vmem:[#allocation2 + $0x710] sm:$0xff] }
  0x3a   :  { %1345 = vmatpush1.bf16.msra.mxu0 %v1344_v62  ;;  %v290_v26 = vld [vmem:[#allocation2 + $0x780] sm:$0xff]  ;;  %v1418_v28 = vpack.c.bf16 %v293_v21, %v277_v20  ;;  %v292_v29 = vld [vmem:[#allocation2 + $0x790] sm:$0xff]  ;;  %v307_v30 = vld [vmem:[#allocation2 + $0x808] sm:$0xff] }
  0x3b   :  { %1409 = vmatpush1.bf16.msra.mxu1 %v1408_v63  ;;  %1347 = vmatprep.subr.bf16.mxu0 %v1346_v0  ;;  %v323_v31 = vld [vmem:[#allocation2 + $0x888] sm:$0xff]  ;;  %v309_v32 = vld [vmem:[#allocation2 + $0x818] sm:$0xff]  ;;  %v1356_v34 = vpack.c.bf16 %v290_v26, %v274_v25  ;;  %v1420_v35 = vpack.c.bf16 %v292_v29, %v276_v27  ;;  %v306_v37 = vld [vmem:[#allocation2 + $0x800] sm:$0xff] }
  0x3c   :  { %1411 = vmatprep.subr.bf16.mxu1 %v1410_v4  ;;  %v325_v33 = vld [vmem:[#allocation2 + $0x898] sm:$0xff]  ;;  %v1358_v36 = vpack.c.bf16 %v323_v31, %v307_v30  ;;  %v322_v38 = vld [vmem:[#allocation2 + $0x880] sm:$0xff]  ;;  %v308_v39 = vld [vmem:[#allocation2 + $0x810] sm:$0xff]  ;;  %v566_v4 = vlaneseq }
  0x3d   :  { %v1422_v40 = vpack.c.bf16 %v325_v33, %v309_v32  ;;  %v324_v41 = vld [vmem:[#allocation2 + $0x890] sm:$0xff]  ;;  %v339_v42 = vld [vmem:[#allocation2 + $0x908] sm:$0xff]  ;;  %v341_v44 = vld [vmem:[#allocation2 + $0x918] sm:$0xff]  ;;  %v1360_v46 = vpack.c.bf16 %v322_v38, %v306_v37 }
  0x3e   :  { %1349 = vmatpush1.bf16.msra.mxu0 %v1348_v10  ;;  %v355_v43 = vld [vmem:[#allocation2 + $0x988] sm:$0xff]  ;;  %v357_v45 = vld [vmem:[#allocation2 + $0x998] sm:$0xff]  ;;  %v1424_v47 = vpack.c.bf16 %v324_v41, %v308_v39  ;;  %v338_v49 = vld [vmem:[#allocation2 + $0x900] sm:$0xff]  ;;  %v1943_v21 = vshrl.u32 %v566_v4, 7 }
  0x3f   :  { %1413 = vmatpush1.bf16.msra.mxu1 %v1412_v11  ;;  %1351 = vmatprep.subr.bf16.mxu0 %v1350_v12  ;;  %v1362_v48 = vpack.c.bf16 %v355_v43, %v339_v42  ;;  %v354_v50 = vld [vmem:[#allocation2 + $0x980] sm:$0xff]  ;;  %v340_v51 = vld [vmem:[#allocation2 + $0x910] sm:$0xff]  ;;  %v1426_v52 = vpack.c.bf16 %v357_v45, %v341_v44  ;;  %v371_v54 = vld [vmem:[#allocation2 + $0xa08] sm:$0xff] }
  0x40   :  { %1415 = vmatprep.subr.bf16.mxu1 %v1414_v16  ;;  %v356_v53 = vld [vmem:[#allocation2 + $0x990] sm:$0xff]  ;;  %v387_v55 = vld [vmem:[#allocation2 + $0xa88] sm:$0xff]  ;;  %v373_v56 = vld [vmem:[#allocation2 + $0xa18] sm:$0xff]  ;;  %v1364_v58 = vpack.c.bf16 %v354_v50, %v338_v49 }
  0x41   :  { %v389_v57 = vld [vmem:[#allocation2 + $0xa98] sm:$0xff]  ;;  %v1428_v59 = vpack.c.bf16 %v356_v53, %v340_v51  ;;  %v1366_v60 = vpack.c.bf16 %v387_v55, %v371_v54  ;;  %v370_v61 = vld [vmem:[#allocation2 + $0xa00] sm:$0xff]  ;;  %v372_v63 = vld [vmem:[#allocation2 + $0xa10] sm:$0xff] }
  0x42   :  { %1353 = vmatpush1.bf16.msra.mxu0 %v1352_v22  ;;  %v386_v62 = vld [vmem:[#allocation2 + $0xa80] sm:$0xff]  ;;  %v1430_v0 = vpack.c.bf16 %v389_v57, %v373_v56  ;;  %v388_v1 = vld [vmem:[#allocation2 + $0xa90] sm:$0xff]  ;;  %v403_v2 = vld [vmem:[#allocation2 + $0xb08] sm:$0xff]  ;;  %v649_v22 = vunpack.c.0.s8 %v648_v6 }
  0x43   :  { %1417 = vmatpush1.bf16.msra.mxu1 %v1416_v23  ;;  %1355 = vmatprep.subr.bf16.mxu0 %v1354_v24  ;;  %v419_v3 = vld [vmem:[#allocation2 + $0xb88] sm:$0xff]  ;;  %v405_v7 = vld [vmem:[#allocation2 + $0xb18] sm:$0xff]  ;;  %v1368_v9 = vpack.c.bf16 %v386_v62, %v370_v61  ;;  %v402_v10 = vld [vmem:[#allocation2 + $0xb00] sm:$0xff]  ;;  %v1432_v12 = vpack.c.bf16 %v388_v1, %v372_v63 }
  0x44   :  { %1419 = vmatprep.subr.bf16.mxu1 %v1418_v28  ;;  %v421_v8 = vld [vmem:[#allocation2 + $0xb98] sm:$0xff]  ;;  %v418_v11 = vld [vmem:[#allocation2 + $0xb80] sm:$0xff]  ;;  %v1370_v13 = vpack.c.bf16 %v419_v3, %v403_v2  ;;  %v404_v14 = vld [vmem:[#allocation2 + $0xb10] sm:$0xff]  ;;  %v1955_v39 = vsub.s32 %v649_v22, %v1943_v21 }
  0x45   :  { %v420_v15 = vld [vmem:[#allocation2 + $0xb90] sm:$0xff]  ;;  %v435_v16 = vld [vmem:[#allocation2 + $0xc08] sm:$0xff]  ;;  %v1434_v17 = vpack.c.bf16 %v421_v8, %v405_v7  ;;  %v437_v19 = vld [vmem:[#allocation2 + $0xc18] sm:$0xff]  ;;  %v1372_v26 = vpack.c.bf16 %v418_v11, %v402_v10 }
  0x46   :  { %1357 = vmatpush1.bf16.msra.mxu0 %v1356_v34  ;;  %v451_v18 = vld [vmem:[#allocation2 + $0xc88] sm:$0xff]  ;;  %v40_v20 = vld [vmem:[%s2008_s0] sm:$0xf]  ;;  %v453_v23 = vld [vmem:[#allocation2 + $0xc98] sm:$0xff]  ;;  %v1436_v29 = vpack.c.bf16 %v420_v15, %v404_v14 }
  0x47   :  { %1421 = vmatpush1.bf16.msra.mxu1 %v1420_v35  ;;  %1359 = vmatprep.subr.bf16.mxu0 %v1358_v36  ;;  %v1323_v24 = vld [vmem:[%s2008_s0 + $0x4] sm:$0xf]  ;;  %v1324_v25 = vld [vmem:[%s2008_s0 + $0x8] sm:$0xf]  ;;  %v1374_v30 = vpack.c.bf16 %v451_v18, %v435_v16  ;;  %v436_v32 = vld [vmem:[#allocation2 + $0xc10] sm:$0xff]  ;;  %v1438_v34 = vpack.c.bf16 %v453_v23, %v437_v19 }
  0x48   :  { %1423 = vmatprep.subr.bf16.mxu1 %v1422_v40  ;;  %v434_v27 = vld [vmem:[#allocation2 + $0xc00] sm:$0xff]  ;;  %v43_v28 = vmax.f32 %v40_v20, %v1323_v24  ;;  %v1325_v33 = vld [vmem:[%s2008_s0 + $0xc] sm:$0xf]  ;;  %v452_v35 = vld [vmem:[#allocation2 + $0xc90] sm:$0xff] }
  0x49   :  { %v450_v31 = vld [vmem:[#allocation2 + $0xc80] sm:$0xff]  ;;  %v467_v36 = vld [vmem:[#allocation2 + $0xd08] sm:$0xff]  ;;  %v469_v40 = vld [vmem:[#allocation2 + $0xd18] sm:$0xff]  ;;  %v1440_v44 = vpack.c.bf16 %v452_v35, %v436_v32 }
  0x4a   :  { %1361 = vmatpush1.bf16.msra.mxu0 %v1360_v46  ;;  %v483_v37 = vld [vmem:[#allocation2 + $0xd88] sm:$0xff]  ;;  %v46_v38 = vmax.f32 %v43_v28, %v1324_v25  ;;  %v485_v41 = vld [vmem:[#allocation2 + $0xd98] sm:$0xff]  ;;  %v1376_v42 = vpack.c.bf16 %v450_v31, %v434_v27  ;;  %v466_v46 = vld [vmem:[#allocation2 + $0xd00] sm:$0xff] }
  0x4b   :  { %1425 = vmatpush1.bf16.msra.mxu1 %v1424_v47  ;;  %1363 = vmatprep.subr.bf16.mxu0 %v1362_v48  ;;  %v1378_v45 = vpack.c.bf16 %v483_v37, %v467_v36  ;;  %v482_v47 = vld [vmem:[#allocation2 + $0xd80] sm:$0xff]  ;;  %v468_v48 = vld [vmem:[#allocation2 + $0xd10] sm:$0xff]  ;;  %v1442_v49 = vpack.c.bf16 %v485_v41, %v469_v40  ;;  %v499_v51 = vld [vmem:[#allocation2 + $0xe08] sm:$0xff] }
  0x4c   :  { %1427 = vmatprep.subr.bf16.mxu1 %v1426_v52  ;;  %v49_v43 = vmax.f32 %v46_v38, %v1325_v33  ;;  %v484_v50 = vld [vmem:[#allocation2 + $0xd90] sm:$0xff]  ;;  %v515_v52 = vld [vmem:[#allocation2 + $0xe88] sm:$0xff]  ;;  %v501_v54 = vld [vmem:[#allocation2 + $0xe18] sm:$0xff]  ;;  %v1380_v56 = vpack.c.bf16 %v482_v47, %v466_v46 }
  0x4d   :  { %v517_v55 = vld [vmem:[#allocation2 + $0xe98] sm:$0xff]  ;;  %v514_v61 = vld [vmem:[#allocation2 + $0xe80] sm:$0xff]  ;;  %v500_v62 = vld [vmem:[#allocation2 + $0xe10] sm:$0xff] }
  0x4e   :  { %1365 = vmatpush1.bf16.msra.mxu0 %v1364_v58  ;;  %v1958_v53 = vrot.slane %v49_v43, %v1955_v39  ;;  %v1444_v58 = vpack.c.bf16 %v484_v50, %v468_v48  ;;  %v1446_v63 = vpack.c.bf16 %v517_v55, %v501_v54  ;;  %v531_v1 = vld [vmem:[#allocation2 + $0xf08] sm:$0xff]  ;;  %v533_v3 = vld [vmem:[#allocation2 + $0xf18] sm:$0xff]  ;;  %v530_v8 = vld [vmem:[#allocation2 + $0xf00] sm:$0xff] }
  0x4f   :  { %1429 = vmatpush1.bf16.msra.mxu1 %v1428_v59  ;;  %1367 = vmatprep.subr.bf16.mxu0 %v1366_v60  ;;  %v1382_v59 = vpack.c.bf16 %v515_v52, %v499_v51  ;;  %v498_v60 = vld [vmem:[#allocation2 + $0xe00] sm:$0xff]  ;;  %v547_v2 = vld [vmem:[#allocation2 + $0xf88] sm:$0xff]  ;;  %v549_v4 = vld [vmem:[#allocation2 + $0xf98] sm:$0xff] }
  0x50   :  { %1431 = vmatprep.subr.bf16.mxu1 %v1430_v0  ;;  %v1962_v57 = vcombine.high %v1958_v53, %v1958_v53  ;;  %v516_v0 = vld [vmem:[#allocation2 + $0xe90] sm:$0xff]  ;;  %v1384_v5 = vpack.c.bf16 %v514_v61, %v498_v60  ;;  %v1386_v7 = vpack.c.bf16 %v547_v2, %v531_v1  ;;  %v1450_v11 = vpack.c.bf16 %v549_v4, %v533_v3  ;;  %v71_v14 = vld [vmem:[#allocation2 + $0xa8] sm:$0xff]  ;;  %v57_v15 = vld [vmem:[#allocation2 + $0x38] sm:$0xff] }
  0x51   :  { %v1448_v6 = vpack.c.bf16 %v516_v0, %v500_v62  ;;  %v532_v10 = vld [vmem:[#allocation2 + $0xf10] sm:$0xff]  ;;  %v73_v16 = vld [vmem:[#allocation2 + $0xb8] sm:$0xff]  ;;  %v54_v20 = vld [vmem:[#allocation2 + $0x20] sm:$0xff] }
  0x52   :  { %1369 = vmatpush1.bf16.msra.mxu0 %v1368_v9  ;;  %721 = vmatprep.mubr.f32.mxu0 %v1962_v57  ;;  %v546_v9 = vld [vmem:[#allocation2 + $0xf80] sm:$0xff]  ;;  %v56_v23 = vld [vmem:[#allocation2 + $0x30] sm:$0xff]  ;;  %v1518_v24 = vpack.c.bf16 %v73_v16, %v57_v15  ;;  %v103_v27 = vld [vmem:[#allocation2 + $0x1a8] sm:$0xff] }
  0x53   :  { %1433 = vmatpush1.bf16.msra.mxu1 %v1432_v12  ;;  %1371 = vmatprep.subr.bf16.mxu0 %v1370_v13  ;;  %v548_v12 = vld [vmem:[#allocation2 + $0xf90] sm:$0xff]  ;;  %v55_v13 = vld [vmem:[#allocation2 + $0x28] sm:$0xff]  ;;  %v70_v22 = vld [vmem:[#allocation2 + $0xa0] sm:$0xff] }
  0x54   :  { %1435 = vmatprep.subr.bf16.mxu1 %v1434_v17  ;;  %792 = vmatprep.mubr.f32.mxu1 %v1962_v57  ;;  %v1388_v17 = vpack.c.bf16 %v546_v9, %v530_v8  ;;  %v1452_v18 = vpack.c.bf16 %v548_v12, %v532_v10  ;;  %v1454_v19 = vpack.c.bf16 %v71_v14, %v55_v13  ;;  %v72_v25 = vld [vmem:[#allocation2 + $0xb0] sm:$0xff]  ;;  %v89_v28 = vld [vmem:[#allocation2 + $0x138] sm:$0xff]  ;;  %v86_v33 = vld [vmem:[#allocation2 + $0x120] sm:$0xff] }
  0x55   :  { %v1520_v31 = vpack.c.bf16 %v72_v25, %v56_v23  ;;  %v88_v35 = vld [vmem:[#allocation2 + $0x130] sm:$0xff]  ;;  %v119_v38 = vld [vmem:[#allocation2 + $0x228] sm:$0xff]  ;;  %v121_v41 = vld [vmem:[#allocation2 + $0x238] sm:$0xff] }
  0x56   :  { %1373 = vmatpush1.bf16.msra.mxu0 %v1372_v26  ;;  %v87_v26 = vld [vmem:[#allocation2 + $0x128] sm:$0xff]  ;;  %v104_v37 = vld [vmem:[#allocation2 + $0x1b0] sm:$0xff]  ;;  %v118_v46 = vld [vmem:[#allocation2 + $0x220] sm:$0xff] }
  0x57   :  { %1437 = vmatpush1.bf16.msra.mxu1 %v1436_v29  ;;  %1375 = vmatprep.subr.bf16.mxu0 %v1374_v30  ;;  %v105_v29 = vld [vmem:[#allocation2 + $0x1b8] sm:$0xff]  ;;  %v1456_v30 = vpack.c.bf16 %v70_v22, %v54_v20  ;;  %v1458_v32 = vpack.c.bf16 %v103_v27, %v87_v26  ;;  %v135_v40 = vld [vmem:[#allocation2 + $0x2a8] sm:$0xff]  ;;  %v134_v47 = vld [vmem:[#allocation2 + $0x2a0] sm:$0xff] }
  0x58   :  { %1439 = vmatprep.subr.bf16.mxu1 %v1438_v34  ;;  %v102_v34 = vld [vmem:[#allocation2 + $0x1a0] sm:$0xff]  ;;  %v1522_v36 = vpack.c.bf16 %v105_v29, %v89_v28  ;;  %v120_v48 = vld [vmem:[#allocation2 + $0x230] sm:$0xff]  ;;  %v151_v51 = vld [vmem:[#allocation2 + $0x328] sm:$0xff] }
  0x59   :  { %v1460_v43 = vpack.c.bf16 %v102_v34, %v86_v33  ;;  %v136_v50 = vld [vmem:[#allocation2 + $0x2b0] sm:$0xff]  ;;  %v167_v52 = vld [vmem:[#allocation2 + $0x3a8] sm:$0xff]  ;;  %v153_v54 = vld [vmem:[#allocation2 + $0x338] sm:$0xff] }
  0x5a   :  { %1377 = vmatpush1.bf16.msra.mxu0 %v1376_v42  ;;  %v137_v42 = vld [vmem:[#allocation2 + $0x2b8] sm:$0xff]  ;;  %v150_v60 = vld [vmem:[#allocation2 + $0x320] sm:$0xff]  ;;  %v152_v62 = vld [vmem:[#allocation2 + $0x330] sm:$0xff] }
  0x5b   :  { %1441 = vmatpush1.bf16.msra.mxu1 %v1440_v44  ;;  %1379 = vmatprep.subr.bf16.mxu0 %v1378_v45  ;;  %v1524_v44 = vpack.c.bf16 %v104_v37, %v88_v35  ;;  %v1462_v45 = vpack.c.bf16 %v135_v40, %v119_v38  ;;  %v169_v55 = vld [vmem:[#allocation2 + $0x3b8] sm:$0xff]  ;;  %v166_v61 = vld [vmem:[#allocation2 + $0x3a0] sm:$0xff]  ;;  %v168_v0 = vld [vmem:[#allocation2 + $0x3b0] sm:$0xff] }
  0x5c   :  { %1443 = vmatprep.subr.bf16.mxu1 %v1442_v49  ;;  %v1526_v49 = vpack.c.bf16 %v137_v42, %v121_v41  ;;  %v183_v1 = vld [vmem:[#allocation2 + $0x428] sm:$0xff]  ;;  %v185_v3 = vld [vmem:[#allocation2 + $0x438] sm:$0xff]  ;;  %v182_v8 = vld [vmem:[#allocation2 + $0x420] sm:$0xff] }
  0x5d   :  { %v199_v2 = vld [vmem:[#allocation2 + $0x4a8] sm:$0xff]  ;;  %v201_v4 = vld [vmem:[#allocation2 + $0x4b8] sm:$0xff]  ;;  %v198_v9 = vld [vmem:[#allocation2 + $0x4a0] sm:$0xff] }
  0x5e   :  { %1381 = vmatpush1.bf16.msra.mxu0 %v1380_v56  ;;  %v1464_v56 = vpack.c.bf16 %v134_v47, %v118_v46  ;;  %v184_v10 = vld [vmem:[#allocation2 + $0x430] sm:$0xff]  ;;  %v215_v13 = vld [vmem:[#allocation2 + $0x528] sm:$0xff]  ;;  %v217_v15 = vld [vmem:[#allocation2 + $0x538] sm:$0xff] }
  0x5f   :  { %1445 = vmatpush1.bf16.msra.mxu1 %v1444_v58  ;;  %1383 = vmatprep.subr.bf16.mxu0 %v1382_v59  ;;  %v1528_v58 = vpack.c.bf16 %v136_v50, %v120_v48  ;;  %v1466_v59 = vpack.c.bf16 %v167_v52, %v151_v51  ;;  %v200_v12 = vld [vmem:[#allocation2 + $0x4b0] sm:$0xff]  ;;  %v231_v14 = vld [vmem:[#allocation2 + $0x5a8] sm:$0xff]  ;;  %v233_v16 = vld [vmem:[#allocation2 + $0x5b8] sm:$0xff] }
  0x60   :  { %1447 = vmatprep.subr.bf16.mxu1 %v1446_v63  ;;  %v1530_v63 = vpack.c.bf16 %v169_v55, %v153_v54  ;;  %v214_v20 = vld [vmem:[#allocation2 + $0x520] sm:$0xff]  ;;  %v216_v23 = vld [vmem:[#allocation2 + $0x530] sm:$0xff]  ;;  %v247_v26 = vld [vmem:[#allocation2 + $0x628] sm:$0xff] }
  0x61   :  { %v230_v22 = vld [vmem:[#allocation2 + $0x5a0] sm:$0xff]  ;;  %v232_v25 = vld [vmem:[#allocation2 + $0x5b0] sm:$0xff]  ;;  %v263_v27 = vld [vmem:[#allocation2 + $0x6a8] sm:$0xff] }
  0x62   :  { %1385 = vmatpush1.bf16.msra.mxu0 %v1384_v5  ;;  %v1468_v5 = vpack.c.bf16 %v166_v61, %v150_v60  ;;  %v249_v28 = vld [vmem:[#allocation2 + $0x638] sm:$0xff]  ;;  %v246_v33 = vld [vmem:[#allocation2 + $0x620] sm:$0xff]  ;;  %v248_v35 = vld [vmem:[#allocation2 + $0x630] sm:$0xff] }
  0x63   :  { %1449 = vmatpush1.bf16.msra.mxu1 %v1448_v6  ;;  %1387 = vmatprep.subr.bf16.mxu0 %v1386_v7  ;;  %v1532_v6 = vpack.c.bf16 %v168_v0, %v152_v62  ;;  %v1470_v7 = vpack.c.bf16 %v199_v2, %v183_v1  ;;  %v265_v29 = vld [vmem:[#allocation2 + $0x6b8] sm:$0xff]  ;;  %v262_v34 = vld [vmem:[#allocation2 + $0x6a0] sm:$0xff]  ;;  %v264_v37 = vld [vmem:[#allocation2 + $0x6b0] sm:$0xff] }
  0x64   :  { %1451 = vmatprep.subr.bf16.mxu1 %v1450_v11  ;;  %v1534_v11 = vpack.c.bf16 %v201_v4, %v185_v3  ;;  %v279_v38 = vld [vmem:[#allocation2 + $0x728] sm:$0xff]  ;;  %v281_v41 = vld [vmem:[#allocation2 + $0x738] sm:$0xff]  ;;  %v278_v46 = vld [vmem:[#allocation2 + $0x720] sm:$0xff] }
  0x65   :  { %v295_v40 = vld [vmem:[#allocation2 + $0x7a8] sm:$0xff]  ;;  %v297_v42 = vld [vmem:[#allocation2 + $0x7b8] sm:$0xff]  ;;  %v294_v47 = vld [vmem:[#allocation2 + $0x7a0] sm:$0xff] }
  0x66   :  { %1389 = vmatpush1.bf16.msra.mxu0 %v1388_v17  ;;  %v1472_v17 = vpack.c.bf16 %v198_v9, %v182_v8  ;;  %v280_v48 = vld [vmem:[#allocation2 + $0x730] sm:$0xff]  ;;  %v311_v51 = vld [vmem:[#allocation2 + $0x828] sm:$0xff]  ;;  %v313_v54 = vld [vmem:[#allocation2 + $0x838] sm:$0xff] }
  0x67   :  { %1453 = vmatpush1.bf16.msra.mxu1 %v1452_v18  ;;  %1455 = vmatprep.subr.bf16.mxu0 %v1454_v19  ;;  %v1536_v18 = vpack.c.bf16 %v200_v12, %v184_v10  ;;  %v1474_v19 = vpack.c.bf16 %v231_v14, %v215_v13  ;;  %v296_v50 = vld [vmem:[#allocation2 + $0x7b0] sm:$0xff]  ;;  %v327_v52 = vld [vmem:[#allocation2 + $0x8a8] sm:$0xff]  ;;  %v329_v55 = vld [vmem:[#allocation2 + $0x8b8] sm:$0xff] }
  0x68   :  { %1519 = vmatprep.subr.bf16.mxu1 %v1518_v24  ;;  %v1538_v24 = vpack.c.bf16 %v233_v16, %v217_v15  ;;  %v310_v60 = vld [vmem:[#allocation2 + $0x820] sm:$0xff]  ;;  %v312_v62 = vld [vmem:[#allocation2 + $0x830] sm:$0xff]  ;;  %v343_v1 = vld [vmem:[#allocation2 + $0x928] sm:$0xff] }
  0x69   :  { %722 = vmatmul.mubr.f32.vlgmr.msra.gmra.mrb[0].mxu0 %v1958_v53  ;;  %v326_v61 = vld [vmem:[#allocation2 + $0x8a0] sm:$0xff]  ;;  %v328_v0 = vld [vmem:[#allocation2 + $0x8b0] sm:$0xff]  ;;  %v359_v2 = vld [vmem:[#allocation2 + $0x9a8] sm:$0xff] }
  0x6a   :  { %793 = vmatmul.mubr.f32.vlgmr.msra.gmra.mrb[0].mxu1 %v1958_v53  ;;  %1457 = vmatpush1.bf16.msra.mxu0 %v1456_v30  ;;  %v1476_v30 = vpack.c.bf16 %v230_v22, %v214_v20  ;;  %v345_v3 = vld [vmem:[#allocation2 + $0x938] sm:$0xff]  ;;  %v342_v8 = vld [vmem:[#allocation2 + $0x920] sm:$0xff]  ;;  %v344_v10 = vld [vmem:[#allocation2 + $0x930] sm:$0xff] }
  0x6b   :  { %1521 = vmatpush1.bf16.msra.mxu1 %v1520_v31  ;;  %1459 = vmatprep.subr.bf16.mxu0 %v1458_v32  ;;  %v1540_v31 = vpack.c.bf16 %v232_v25, %v216_v23  ;;  %v1478_v32 = vpack.c.bf16 %v263_v27, %v247_v26  ;;  %v361_v4 = vld [vmem:[#allocation2 + $0x9b8] sm:$0xff]  ;;  %v358_v9 = vld [vmem:[#allocation2 + $0x9a0] sm:$0xff]  ;;  %v360_v12 = vld [vmem:[#allocation2 + $0x9b0] sm:$0xff] }
  0x6c   :  { %1523 = vmatprep.subr.bf16.mxu1 %v1522_v36  ;;  %863 = vmatprep.mubr.f32.mxu0 %v1962_v57  ;;  %v1542_v36 = vpack.c.bf16 %v265_v29, %v249_v28  ;;  %v375_v13 = vld [vmem:[#allocation2 + $0xa28] sm:$0xff]  ;;  %v377_v15 = vld [vmem:[#allocation2 + $0xa38] sm:$0xff]  ;;  %v374_v20 = vld [vmem:[#allocation2 + $0xa20] sm:$0xff] }
  0x6d   :  { %934 = vmatprep.mubr.f32.mxu1 %v1962_v57  ;;  %v391_v14 = vld [vmem:[#allocation2 + $0xaa8] sm:$0xff]  ;;  %v393_v16 = vld [vmem:[#allocation2 + $0xab8] sm:$0xff]  ;;  %v390_v22 = vld [vmem:[#allocation2 + $0xaa0] sm:$0xff] }
  0x6e   :  { %1461 = vmatpush1.bf16.msra.mxu0 %v1460_v43  ;;  %v1480_v43 = vpack.c.bf16 %v262_v34, %v246_v33  ;;  %v376_v23 = vld [vmem:[#allocation2 + $0xa30] sm:$0xff]  ;;  %v407_v26 = vld [vmem:[#allocation2 + $0xb28] sm:$0xff]  ;;  %v409_v28 = vld [vmem:[#allocation2 + $0xb38] sm:$0xff] }
  0x6f   :  { %1525 = vmatpush1.bf16.msra.mxu1 %v1524_v44  ;;  %1463 = vmatprep.subr.bf16.mxu0 %v1462_v45  ;;  %v1544_v44 = vpack.c.bf16 %v264_v37, %v248_v35  ;;  %v1482_v45 = vpack.c.bf16 %v295_v40, %v279_v38  ;;  %v392_v25 = vld [vmem:[#allocation2 + $0xab0] sm:$0xff]  ;;  %v423_v27 = vld [vmem:[#allocation2 + $0xba8] sm:$0xff]  ;;  %v425_v29 = vld [vmem:[#allocation2 + $0xbb8] sm:$0xff] }
  0x70   :  { %1527 = vmatprep.subr.bf16.mxu1 %v1526_v49  ;;  %v1546_v49 = vpack.c.bf16 %v297_v42, %v281_v41  ;;  %v406_v33 = vld [vmem:[#allocation2 + $0xb20] sm:$0xff]  ;;  %v408_v35 = vld [vmem:[#allocation2 + $0xb30] sm:$0xff]  ;;  %v439_v38 = vld [vmem:[#allocation2 + $0xc28] sm:$0xff] }
  0x71   :  { %v422_v34 = vld [vmem:[#allocation2 + $0xba0] sm:$0xff]  ;;  %v424_v37 = vld [vmem:[#allocation2 + $0xbb0] sm:$0xff]  ;;  %v455_v40 = vld [vmem:[#allocation2 + $0xca8] sm:$0xff] }
  0x72   :  { %1465 = vmatpush1.bf16.msra.mxu0 %v1464_v56  ;;  %v1484_v56 = vpack.c.bf16 %v294_v47, %v278_v46  ;;  %v441_v41 = vld [vmem:[#allocation2 + $0xc38] sm:$0xff]  ;;  %v438_v46 = vld [vmem:[#allocation2 + $0xc20] sm:$0xff] }
  0x73   :  { %1529 = vmatpush1.bf16.msra.mxu1 %v1528_v58  ;;  %1467 = vmatprep.subr.bf16.mxu0 %v1466_v59  ;;  %v1548_v58 = vpack.c.bf16 %v296_v50, %v280_v48  ;;  %v1486_v59 = vpack.c.bf16 %v327_v52, %v311_v51  ;;  %v457_v42 = vld [vmem:[#allocation2 + $0xcb8] sm:$0xff]  ;;  %v454_v47 = vld [vmem:[#allocation2 + $0xca0] sm:$0xff]  ;;  %v440_v48 = vld [vmem:[#allocation2 + $0xc30] sm:$0xff] }
  0x74   :  { %1531 = vmatprep.subr.bf16.mxu1 %v1530_v63  ;;  %v1550_v63 = vpack.c.bf16 %v329_v55, %v313_v54  ;;  %v456_v50 = vld [vmem:[#allocation2 + $0xcb0] sm:$0xff]  ;;  %v471_v51 = vld [vmem:[#allocation2 + $0xd28] sm:$0xff]  ;;  %v473_v54 = vld [vmem:[#allocation2 + $0xd38] sm:$0xff] }
  0x75   :  { %v487_v52 = vld [vmem:[#allocation2 + $0xda8] sm:$0xff]  ;;  %v489_v55 = vld [vmem:[#allocation2 + $0xdb8] sm:$0xff] }
  0x76   :  { %1469 = vmatpush1.bf16.msra.mxu0 %v1468_v5  ;;  %v1488_v5 = vpack.c.bf16 %v326_v61, %v310_v60  ;;  %v470_v60 = vld [vmem:[#allocation2 + $0xd20] sm:$0xff] }
  0x77   :  { %1533 = vmatpush1.bf16.msra.mxu1 %v1532_v6  ;;  %1471 = vmatprep.subr.bf16.mxu0 %v1470_v7  ;;  %v1552_v6 = vpack.c.bf16 %v328_v0, %v312_v62  ;;  %v1490_v7 = vpack.c.bf16 %v359_v2, %v343_v1  ;;  %v486_v61 = vld [vmem:[#allocation2 + $0xda0] sm:$0xff]  ;;  %v472_v62 = vld [vmem:[#allocation2 + $0xd30] sm:$0xff]  ;;  %v503_v1 = vld [vmem:[#allocation2 + $0xe28] sm:$0xff] }
  0x78   :  { %1535 = vmatprep.subr.bf16.mxu1 %v1534_v11  ;;  %v1554_v11 = vpack.c.bf16 %v361_v4, %v345_v3  ;;  %v488_v0 = vld [vmem:[#allocation2 + $0xdb0] sm:$0xff]  ;;  %v519_v2 = vld [vmem:[#allocation2 + $0xea8] sm:$0xff]  ;;  %v505_v3 = vld [vmem:[#allocation2 + $0xe38] sm:$0xff] }
  0x79   :  { %v521_v4 = vld [vmem:[#allocation2 + $0xeb8] sm:$0xff] }
  0x7a   :  { %1473 = vmatpush1.bf16.msra.mxu0 %v1472_v17  ;;  %v1492_v17 = vpack.c.bf16 %v358_v9, %v342_v8  ;;  %v502_v8 = vld [vmem:[#allocation2 + $0xe20] sm:$0xff] }
  0x7b   :  { %1537 = vmatpush1.bf16.msra.mxu1 %v1536_v18  ;;  %1475 = vmatprep.subr.bf16.mxu0 %v1474_v19  ;;  %v1556_v18 = vpack.c.bf16 %v360_v12, %v344_v10  ;;  %v1494_v19 = vpack.c.bf16 %v391_v14, %v375_v13  ;;  %v518_v9 = vld [vmem:[#allocation2 + $0xea0] sm:$0xff]  ;;  %v504_v10 = vld [vmem:[#allocation2 + $0xe30] sm:$0xff]  ;;  %v535_v13 = vld [vmem:[#allocation2 + $0xf28] sm:$0xff] }
  0x7c   :  { %1539 = vmatprep.subr.bf16.mxu1 %v1538_v24  ;;  %v1558_v24 = vpack.c.bf16 %v393_v16, %v377_v15  ;;  %v520_v12 = vld [vmem:[#allocation2 + $0xeb0] sm:$0xff]  ;;  %v551_v14 = vld [vmem:[#allocation2 + $0xfa8] sm:$0xff]  ;;  %v537_v15 = vld [vmem:[#allocation2 + $0xf38] sm:$0xff] }
  0x7d   :  { %v553_v16 = vld [vmem:[#allocation2 + $0xfb8] sm:$0xff] }
  0x7e   :  { %1477 = vmatpush1.bf16.msra.mxu0 %v1476_v30  ;;  %v1496_v30 = vpack.c.bf16 %v390_v22, %v374_v20  ;;  %v534_v20 = vld [vmem:[#allocation2 + $0xf20] sm:$0xff] }
  0x7f   :  { %1541 = vmatpush1.bf16.msra.mxu1 %v1540_v31  ;;  %1479 = vmatprep.subr.bf16.mxu0 %v1478_v32  ;;  %v1560_v31 = vpack.c.bf16 %v392_v25, %v376_v23  ;;  %v1498_v32 = vpack.c.bf16 %v423_v27, %v407_v26  ;;  %v550_v22 = vld [vmem:[#allocation2 + $0xfa0] sm:$0xff]  ;;  %v536_v23 = vld [vmem:[#allocation2 + $0xf30] sm:$0xff]  ;;  %v59_v26 = vld [vmem:[#allocation2 + $0x48] sm:$0xff] }
  0x80   :  { %1543 = vmatprep.subr.bf16.mxu1 %v1542_v36  ;;  %v1562_v36 = vpack.c.bf16 %v425_v29, %v409_v28  ;;  %v552_v25 = vld [vmem:[#allocation2 + $0xfb0] sm:$0xff]  ;;  %v75_v27 = vld [vmem:[#allocation2 + $0xc8] sm:$0xff]  ;;  %v61_v28 = vld [vmem:[#allocation2 + $0x58] sm:$0xff] }
  0x81   :  { %v77_v29 = vld [vmem:[#allocation2 + $0xd8] sm:$0xff] }
  0x82   :  { %1481 = vmatpush1.bf16.msra.mxu0 %v1480_v43  ;;  %v1500_v43 = vpack.c.bf16 %v422_v34, %v406_v33  ;;  %v58_v33 = vld [vmem:[#allocation2 + $0x40] sm:$0xff] }
  0x83   :  { %1545 = vmatpush1.bf16.msra.mxu1 %v1544_v44  ;;  %1483 = vmatprep.subr.bf16.mxu0 %v1482_v45  ;;  %v1564_v44 = vpack.c.bf16 %v424_v37, %v408_v35  ;;  %v1502_v45 = vpack.c.bf16 %v455_v40, %v439_v38  ;;  %v74_v34 = vld [vmem:[#allocation2 + $0xc0] sm:$0xff]  ;;  %v60_v35 = vld [vmem:[#allocation2 + $0x50] sm:$0xff]  ;;  %v91_v38 = vld [vmem:[#allocation2 + $0x148] sm:$0xff] }
  0x84   :  { %1547 = vmatprep.subr.bf16.mxu1 %v1546_v49  ;;  %v1566_v49 = vpack.c.bf16 %v457_v42, %v441_v41  ;;  %v76_v37 = vld [vmem:[#allocation2 + $0xd0] sm:$0xff]  ;;  %v107_v40 = vld [vmem:[#allocation2 + $0x1c8] sm:$0xff]  ;;  %v93_v41 = vld [vmem:[#allocation2 + $0x158] sm:$0xff] }
  0x85   :  { %v109_v42 = vld [vmem:[#allocation2 + $0x1d8] sm:$0xff] }
  0x86   :  { %1485 = vmatpush1.bf16.msra.mxu0 %v1484_v56  ;;  %v1504_v56 = vpack.c.bf16 %v454_v47, %v438_v46  ;;  %v90_v46 = vld [vmem:[#allocation2 + $0x140] sm:$0xff] }
  0x87   :  { %1549 = vmatpush1.bf16.msra.mxu1 %v1548_v58  ;;  %1487 = vmatprep.subr.bf16.mxu0 %v1486_v59  ;;  %v1568_v58 = vpack.c.bf16 %v456_v50, %v440_v48  ;;  %v1506_v59 = vpack.c.bf16 %v487_v52, %v471_v51  ;;  %v106_v47 = vld [vmem:[#allocation2 + $0x1c0] sm:$0xff]  ;;  %v92_v48 = vld [vmem:[#allocation2 + $0x150] sm:$0xff]  ;;  %v123_v51 = vld [vmem:[#allocation2 + $0x248] sm:$0xff] }
  0x88   :  { %1551 = vmatprep.subr.bf16.mxu1 %v1550_v63  ;;  %v1570_v63 = vpack.c.bf16 %v489_v55, %v473_v54  ;;  %v108_v50 = vld [vmem:[#allocation2 + $0x1d0] sm:$0xff]  ;;  %v139_v52 = vld [vmem:[#allocation2 + $0x2c8] sm:$0xff]  ;;  %v125_v54 = vld [vmem:[#allocation2 + $0x258] sm:$0xff] }
  0x89   :  { %v141_v55 = vld [vmem:[#allocation2 + $0x2d8] sm:$0xff] }
  0x8a   :  { %1489 = vmatpush1.bf16.msra.mxu0 %v1488_v5  ;;  %v1508_v5 = vpack.c.bf16 %v486_v61, %v470_v60  ;;  %v122_v60 = vld [vmem:[#allocation2 + $0x240] sm:$0xff] }
  0x8b   :  { %1553 = vmatpush1.bf16.msra.mxu1 %v1552_v6  ;;  %1491 = vmatprep.subr.bf16.mxu0 %v1490_v7  ;;  %v1572_v6 = vpack.c.bf16 %v488_v0, %v472_v62  ;;  %v1510_v7 = vpack.c.bf16 %v519_v2, %v503_v1  ;;  %v138_v61 = vld [vmem:[#allocation2 + $0x2c0] sm:$0xff]  ;;  %v124_v62 = vld [vmem:[#allocation2 + $0x250] sm:$0xff]  ;;  %v155_v1 = vld [vmem:[#allocation2 + $0x348] sm:$0xff] }
  0x8c   :  { %1555 = vmatprep.subr.bf16.mxu1 %v1554_v11  ;;  %v1574_v11 = vpack.c.bf16 %v521_v4, %v505_v3  ;;  %v140_v0 = vld [vmem:[#allocation2 + $0x2d0] sm:$0xff]  ;;  %v171_v2 = vld [vmem:[#allocation2 + $0x3c8] sm:$0xff]  ;;  %v157_v3 = vld [vmem:[#allocation2 + $0x358] sm:$0xff] }
  0x8d   :  { %v173_v4 = vld [vmem:[#allocation2 + $0x3d8] sm:$0xff] }
  0x8e   :  { %1493 = vmatpush1.bf16.msra.mxu0 %v1492_v17  ;;  %v1512_v17 = vpack.c.bf16 %v518_v9, %v502_v8  ;;  %v154_v8 = vld [vmem:[#allocation2 + $0x340] sm:$0xff] }
  0x8f   :  { %1557 = vmatpush1.bf16.msra.mxu1 %v1556_v18  ;;  %1495 = vmatprep.subr.bf16.mxu0 %v1494_v19  ;;  %v1576_v18 = vpack.c.bf16 %v520_v12, %v504_v10  ;;  %v1514_v19 = vpack.c.bf16 %v551_v14, %v535_v13  ;;  %v170_v9 = vld [vmem:[#allocation2 + $0x3c0] sm:$0xff]  ;;  %v156_v10 = vld [vmem:[#allocation2 + $0x350] sm:$0xff]  ;;  %v187_v13 = vld [vmem:[#allocation2 + $0x448] sm:$0xff] }
  0x90   :  { %1559 = vmatprep.subr.bf16.mxu1 %v1558_v24  ;;  %v1578_v24 = vpack.c.bf16 %v553_v16, %v537_v15  ;;  %v172_v12 = vld [vmem:[#allocation2 + $0x3d0] sm:$0xff]  ;;  %v203_v14 = vld [vmem:[#allocation2 + $0x4c8] sm:$0xff]  ;;  %v189_v15 = vld [vmem:[#allocation2 + $0x458] sm:$0xff] }
  0x91   :  { %v205_v16 = vld [vmem:[#allocation2 + $0x4d8] sm:$0xff] }
  0x92   :  { %1497 = vmatpush1.bf16.msra.mxu0 %v1496_v30  ;;  %v1516_v30 = vpack.c.bf16 %v550_v22, %v534_v20  ;;  %v186_v20 = vld [vmem:[#allocation2 + $0x440] sm:$0xff] }
  0x93   :  { %1561 = vmatpush1.bf16.msra.mxu1 %v1560_v31  ;;  %1499 = vmatprep.subr.bf16.mxu0 %v1498_v32  ;;  %v1580_v31 = vpack.c.bf16 %v552_v25, %v536_v23  ;;  %v1582_v32 = vpack.c.bf16 %v75_v27, %v59_v26  ;;  %v202_v22 = vld [vmem:[#allocation2 + $0x4c0] sm:$0xff]  ;;  %v188_v23 = vld [vmem:[#allocation2 + $0x450] sm:$0xff]  ;;  %v219_v26 = vld [vmem:[#allocation2 + $0x548] sm:$0xff] }
  0x94   :  { %1563 = vmatprep.subr.bf16.mxu1 %v1562_v36  ;;  %v1646_v36 = vpack.c.bf16 %v77_v29, %v61_v28  ;;  %v204_v25 = vld [vmem:[#allocation2 + $0x4d0] sm:$0xff]  ;;  %v235_v27 = vld [vmem:[#allocation2 + $0x5c8] sm:$0xff]  ;;  %v221_v28 = vld [vmem:[#allocation2 + $0x558] sm:$0xff] }
  0x95   :  { %v237_v29 = vld [vmem:[#allocation2 + $0x5d8] sm:$0xff] }
  0x96   :  { %1501 = vmatpush1.bf16.msra.mxu0 %v1500_v43  ;;  %v1584_v43 = vpack.c.bf16 %v74_v34, %v58_v33  ;;  %v218_v33 = vld [vmem:[#allocation2 + $0x540] sm:$0xff] }
  0x97   :  { %1565 = vmatpush1.bf16.msra.mxu1 %v1564_v44  ;;  %1503 = vmatprep.subr.bf16.mxu0 %v1502_v45  ;;  %v1648_v44 = vpack.c.bf16 %v76_v37, %v60_v35  ;;  %v1586_v45 = vpack.c.bf16 %v107_v40, %v91_v38  ;;  %v234_v34 = vld [vmem:[#allocation2 + $0x5c0] sm:$0xff]  ;;  %v220_v35 = vld [vmem:[#allocation2 + $0x550] sm:$0xff]  ;;  %v251_v38 = vld [vmem:[#allocation2 + $0x648] sm:$0xff] }
  0x98   :  { %1567 = vmatprep.subr.bf16.mxu1 %v1566_v49  ;;  %v1650_v49 = vpack.c.bf16 %v109_v42, %v93_v41  ;;  %v236_v37 = vld [vmem:[#allocation2 + $0x5d0] sm:$0xff]  ;;  %v267_v40 = vld [vmem:[#allocation2 + $0x6c8] sm:$0xff]  ;;  %v253_v41 = vld [vmem:[#allocation2 + $0x658] sm:$0xff] }
  0x99   :  { %v269_v42 = vld [vmem:[#allocation2 + $0x6d8] sm:$0xff] }
  0x9a   :  { %1505 = vmatpush1.bf16.msra.mxu0 %v1504_v56  ;;  %v1588_v56 = vpack.c.bf16 %v106_v47, %v90_v46  ;;  %v250_v46 = vld [vmem:[#allocation2 + $0x640] sm:$0xff] }
  0x9b   :  { %1569 = vmatpush1.bf16.msra.mxu1 %v1568_v58  ;;  %1507 = vmatprep.subr.bf16.mxu0 %v1506_v59  ;;  %v1652_v58 = vpack.c.bf16 %v108_v50, %v92_v48  ;;  %v1590_v59 = vpack.c.bf16 %v139_v52, %v123_v51  ;;  %v266_v47 = vld [vmem:[#allocation2 + $0x6c0] sm:$0xff]  ;;  %v252_v48 = vld [vmem:[#allocation2 + $0x650] sm:$0xff]  ;;  %v283_v51 = vld [vmem:[#allocation2 + $0x748] sm:$0xff] }
  0x9c   :  { %1571 = vmatprep.subr.bf16.mxu1 %v1570_v63  ;;  %v1654_v63 = vpack.c.bf16 %v141_v55, %v125_v54  ;;  %v268_v50 = vld [vmem:[#allocation2 + $0x6d0] sm:$0xff]  ;;  %v299_v52 = vld [vmem:[#allocation2 + $0x7c8] sm:$0xff]  ;;  %v285_v54 = vld [vmem:[#allocation2 + $0x758] sm:$0xff] }
  0x9d   :  { %v301_v55 = vld [vmem:[#allocation2 + $0x7d8] sm:$0xff] }
  0x9e   :  { %1509 = vmatpush1.bf16.msra.mxu0 %v1508_v5  ;;  %v1592_v5 = vpack.c.bf16 %v138_v61, %v122_v60  ;;  %v282_v60 = vld [vmem:[#allocation2 + $0x740] sm:$0xff] }
  0x9f   :  { %1573 = vmatpush1.bf16.msra.mxu1 %v1572_v6  ;;  %1511 = vmatprep.subr.bf16.mxu0 %v1510_v7  ;;  %v1656_v6 = vpack.c.bf16 %v140_v0, %v124_v62  ;;  %v1594_v7 = vpack.c.bf16 %v171_v2, %v155_v1  ;;  %v298_v61 = vld [vmem:[#allocation2 + $0x7c0] sm:$0xff]  ;;  %v284_v62 = vld [vmem:[#allocation2 + $0x750] sm:$0xff]  ;;  %v315_v1 = vld [vmem:[#allocation2 + $0x848] sm:$0xff] }
  0xa0   :  { %1575 = vmatprep.subr.bf16.mxu1 %v1574_v11  ;;  %v1658_v11 = vpack.c.bf16 %v173_v4, %v157_v3  ;;  %v300_v0 = vld [vmem:[#allocation2 + $0x7d0] sm:$0xff]  ;;  %v331_v2 = vld [vmem:[#allocation2 + $0x8c8] sm:$0xff]  ;;  %v317_v3 = vld [vmem:[#allocation2 + $0x858] sm:$0xff] }
  0xa1   :  { %v333_v4 = vld [vmem:[#allocation2 + $0x8d8] sm:$0xff] }
  0xa2   :  { %1513 = vmatpush1.bf16.msra.mxu0 %v1512_v17  ;;  %v1596_v17 = vpack.c.bf16 %v170_v9, %v154_v8  ;;  %v314_v8 = vld [vmem:[#allocation2 + $0x840] sm:$0xff] }
  0xa3   :  { %1577 = vmatpush1.bf16.msra.mxu1 %v1576_v18  ;;  %1515 = vmatprep.subr.bf16.mxu0 %v1514_v19  ;;  %v1660_v18 = vpack.c.bf16 %v172_v12, %v156_v10  ;;  %v1598_v19 = vpack.c.bf16 %v203_v14, %v187_v13  ;;  %v330_v9 = vld [vmem:[#allocation2 + $0x8c0] sm:$0xff]  ;;  %v316_v10 = vld [vmem:[#allocation2 + $0x850] sm:$0xff]  ;;  %v347_v13 = vld [vmem:[#allocation2 + $0x948] sm:$0xff] }
  0xa4   :  { %1579 = vmatprep.subr.bf16.mxu1 %v1578_v24  ;;  %v1662_v24 = vpack.c.bf16 %v205_v16, %v189_v15  ;;  %v332_v12 = vld [vmem:[#allocation2 + $0x8d0] sm:$0xff]  ;;  %v363_v14 = vld [vmem:[#allocation2 + $0x9c8] sm:$0xff]  ;;  %v349_v15 = vld [vmem:[#allocation2 + $0x958] sm:$0xff] }
  0xa5   :  { %v365_v16 = vld [vmem:[#allocation2 + $0x9d8] sm:$0xff] }
  0xa6   :  { %1517 = vmatpush1.bf16.msra.mxu0 %v1516_v30  ;;  %v1600_v30 = vpack.c.bf16 %v202_v22, %v186_v20  ;;  %v346_v20 = vld [vmem:[#allocation2 + $0x940] sm:$0xff] }
  0xa7   :  { %1581 = vmatpush1.bf16.msra.mxu1 %v1580_v31  ;;  %1583 = vmatprep.subr.bf16.mxu0 %v1582_v32  ;;  %v1664_v31 = vpack.c.bf16 %v204_v25, %v188_v23  ;;  %v1602_v32 = vpack.c.bf16 %v235_v27, %v219_v26  ;;  %v362_v22 = vld [vmem:[#allocation2 + $0x9c0] sm:$0xff]  ;;  %v348_v23 = vld [vmem:[#allocation2 + $0x950] sm:$0xff]  ;;  %v379_v26 = vld [vmem:[#allocation2 + $0xa48] sm:$0xff] }
  0xa8   :  { %1647 = vmatprep.subr.bf16.mxu1 %v1646_v36  ;;  %v1666_v36 = vpack.c.bf16 %v237_v29, %v221_v28  ;;  %v364_v25 = vld [vmem:[#allocation2 + $0x9d0] sm:$0xff]  ;;  %v395_v27 = vld [vmem:[#allocation2 + $0xac8] sm:$0xff]  ;;  %v381_v28 = vld [vmem:[#allocation2 + $0xa58] sm:$0xff] }
  0xa9   :  { %864 = vmatmul.mubr.f32.vlgmr.msra.gmra.mrb[2].mxu0 %v1958_v53  ;;  %v397_v29 = vld [vmem:[#allocation2 + $0xad8] sm:$0xff] }
  0xaa   :  { %935 = vmatmul.mubr.f32.vlgmr.msra.gmra.mrb[2].mxu1 %v1958_v53  ;;  %1585 = vmatpush1.bf16.msra.mxu0 %v1584_v43  ;;  %v1604_v43 = vpack.c.bf16 %v234_v34, %v218_v33  ;;  %v378_v33 = vld [vmem:[#allocation2 + $0xa40] sm:$0xff] }
  0xab   :  { %1649 = vmatpush1.bf16.msra.mxu1 %v1648_v44  ;;  %1587 = vmatprep.subr.bf16.mxu0 %v1586_v45  ;;  %v1668_v44 = vpack.c.bf16 %v236_v37, %v220_v35  ;;  %v1606_v45 = vpack.c.bf16 %v267_v40, %v251_v38  ;;  %v394_v34 = vld [vmem:[#allocation2 + $0xac0] sm:$0xff]  ;;  %v380_v35 = vld [vmem:[#allocation2 + $0xa50] sm:$0xff]  ;;  %v411_v38 = vld [vmem:[#allocation2 + $0xb48] sm:$0xff] }
  0xac   :  { %1651 = vmatprep.subr.bf16.mxu1 %v1650_v49  ;;  %1005 = vmatprep.mubr.f32.mxu0 %v1962_v57  ;;  %v1670_v49 = vpack.c.bf16 %v269_v42, %v253_v41  ;;  %v396_v37 = vld [vmem:[#allocation2 + $0xad0] sm:$0xff]  ;;  %v427_v40 = vld [vmem:[#allocation2 + $0xbc8] sm:$0xff]  ;;  %v413_v41 = vld [vmem:[#allocation2 + $0xb58] sm:$0xff] }
  0xad   :  { %1076 = vmatprep.mubr.f32.mxu1 %v1962_v57  ;;  %v429_v42 = vld [vmem:[#allocation2 + $0xbd8] sm:$0xff] }
  0xae   :  { %1589 = vmatpush1.bf16.msra.mxu0 %v1588_v56  ;;  %v1608_v56 = vpack.c.bf16 %v266_v47, %v250_v46  ;;  %v410_v46 = vld [vmem:[#allocation2 + $0xb40] sm:$0xff] }
  0xaf   :  { %1653 = vmatpush1.bf16.msra.mxu1 %v1652_v58  ;;  %1591 = vmatprep.subr.bf16.mxu0 %v1590_v59  ;;  %v1672_v58 = vpack.c.bf16 %v268_v50, %v252_v48  ;;  %v1610_v59 = vpack.c.bf16 %v299_v52, %v283_v51  ;;  %v426_v47 = vld [vmem:[#allocation2 + $0xbc0] sm:$0xff]  ;;  %v412_v48 = vld [vmem:[#allocation2 + $0xb50] sm:$0xff]  ;;  %v443_v51 = vld [vmem:[#allocation2 + $0xc48] sm:$0xff] }
  0xb0   :  { %1655 = vmatprep.subr.bf16.mxu1 %v1654_v63  ;;  %v1674_v63 = vpack.c.bf16 %v301_v55, %v285_v54  ;;  %v428_v50 = vld [vmem:[#allocation2 + $0xbd0] sm:$0xff]  ;;  %v459_v52 = vld [vmem:[#allocation2 + $0xcc8] sm:$0xff]  ;;  %v445_v54 = vld [vmem:[#allocation2 + $0xc58] sm:$0xff] }
  0xb1   :  { %v461_v55 = vld [vmem:[#allocation2 + $0xcd8] sm:$0xff] }
  0xb2   :  { %1593 = vmatpush1.bf16.msra.mxu0 %v1592_v5  ;;  %v1612_v5 = vpack.c.bf16 %v298_v61, %v282_v60  ;;  %v442_v60 = vld [vmem:[#allocation2 + $0xc40] sm:$0xff] }
  0xb3   :  { %1657 = vmatpush1.bf16.msra.mxu1 %v1656_v6  ;;  %1595 = vmatprep.subr.bf16.mxu0 %v1594_v7  ;;  %v1676_v6 = vpack.c.bf16 %v300_v0, %v284_v62  ;;  %v1614_v7 = vpack.c.bf16 %v331_v2, %v315_v1  ;;  %v458_v61 = vld [vmem:[#allocation2 + $0xcc0] sm:$0xff]  ;;  %v444_v62 = vld [vmem:[#allocation2 + $0xc50] sm:$0xff]  ;;  %v475_v1 = vld [vmem:[#allocation2 + $0xd48] sm:$0xff] }
  0xb4   :  { %1659 = vmatprep.subr.bf16.mxu1 %v1658_v11  ;;  %v1678_v11 = vpack.c.bf16 %v333_v4, %v317_v3  ;;  %v460_v0 = vld [vmem:[#allocation2 + $0xcd0] sm:$0xff]  ;;  %v491_v2 = vld [vmem:[#allocation2 + $0xdc8] sm:$0xff]  ;;  %v477_v3 = vld [vmem:[#allocation2 + $0xd58] sm:$0xff] }
  0xb5   :  { %v493_v4 = vld [vmem:[#allocation2 + $0xdd8] sm:$0xff] }
  0xb6   :  { %1597 = vmatpush1.bf16.msra.mxu0 %v1596_v17  ;;  %v1616_v17 = vpack.c.bf16 %v330_v9, %v314_v8  ;;  %v474_v8 = vld [vmem:[#allocation2 + $0xd40] sm:$0xff] }
  0xb7   :  { %1661 = vmatpush1.bf16.msra.mxu1 %v1660_v18  ;;  %1599 = vmatprep.subr.bf16.mxu0 %v1598_v19  ;;  %v1680_v18 = vpack.c.bf16 %v332_v12, %v316_v10  ;;  %v1618_v19 = vpack.c.bf16 %v363_v14, %v347_v13  ;;  %v490_v9 = vld [vmem:[#allocation2 + $0xdc0] sm:$0xff]  ;;  %v476_v10 = vld [vmem:[#allocation2 + $0xd50] sm:$0xff]  ;;  %v507_v13 = vld [vmem:[#allocation2 + $0xe48] sm:$0xff] }
  0xb8   :  { %1663 = vmatprep.subr.bf16.mxu1 %v1662_v24  ;;  %v1682_v24 = vpack.c.bf16 %v365_v16, %v349_v15  ;;  %v492_v12 = vld [vmem:[#allocation2 + $0xdd0] sm:$0xff]  ;;  %v523_v14 = vld [vmem:[#allocation2 + $0xec8] sm:$0xff]  ;;  %v509_v15 = vld [vmem:[#allocation2 + $0xe58] sm:$0xff] }
  0xb9   :  { %v525_v16 = vld [vmem:[#allocation2 + $0xed8] sm:$0xff] }
  0xba   :  { %1601 = vmatpush1.bf16.msra.mxu0 %v1600_v30  ;;  %v1620_v30 = vpack.c.bf16 %v362_v22, %v346_v20  ;;  %v506_v20 = vld [vmem:[#allocation2 + $0xe40] sm:$0xff] }
  0xbb   :  { %1665 = vmatpush1.bf16.msra.mxu1 %v1664_v31  ;;  %1603 = vmatprep.subr.bf16.mxu0 %v1602_v32  ;;  %v1684_v31 = vpack.c.bf16 %v364_v25, %v348_v23  ;;  %v1622_v32 = vpack.c.bf16 %v395_v27, %v379_v26  ;;  %v522_v22 = vld [vmem:[#allocation2 + $0xec0] sm:$0xff]  ;;  %v508_v23 = vld [vmem:[#allocation2 + $0xe50] sm:$0xff]  ;;  %v539_v26 = vld [vmem:[#allocation2 + $0xf48] sm:$0xff] }
  0xbc   :  { %1667 = vmatprep.subr.bf16.mxu1 %v1666_v36  ;;  %v1686_v36 = vpack.c.bf16 %v397_v29, %v381_v28  ;;  %v524_v25 = vld [vmem:[#allocation2 + $0xed0] sm:$0xff]  ;;  %v555_v27 = vld [vmem:[#allocation2 + $0xfc8] sm:$0xff]  ;;  %v541_v28 = vld [vmem:[#allocation2 + $0xf58] sm:$0xff] }
  0xbd   :  { %v557_v29 = vld [vmem:[#allocation2 + $0xfd8] sm:$0xff] }
  0xbe   :  { %1605 = vmatpush1.bf16.msra.mxu0 %v1604_v43  ;;  %v1624_v43 = vpack.c.bf16 %v394_v34, %v378_v33  ;;  %v538_v33 = vld [vmem:[#allocation2 + $0xf40] sm:$0xff] }
  0xbf   :  { %1669 = vmatpush1.bf16.msra.mxu1 %v1668_v44  ;;  %1607 = vmatprep.subr.bf16.mxu0 %v1606_v45  ;;  %v1688_v44 = vpack.c.bf16 %v396_v37, %v380_v35  ;;  %v1626_v45 = vpack.c.bf16 %v427_v40, %v411_v38  ;;  %v554_v34 = vld [vmem:[#allocation2 + $0xfc0] sm:$0xff]  ;;  %v540_v35 = vld [vmem:[#allocation2 + $0xf50] sm:$0xff]  ;;  %v63_v38 = vld [vmem:[#allocation2 + $0x68] sm:$0xff] }
  0xc0   :  { %1671 = vmatprep.subr.bf16.mxu1 %v1670_v49  ;;  %v1690_v49 = vpack.c.bf16 %v429_v42, %v413_v41  ;;  %v556_v37 = vld [vmem:[#allocation2 + $0xfd0] sm:$0xff]  ;;  %v79_v40 = vld [vmem:[#allocation2 + $0xe8] sm:$0xff]  ;;  %v65_v41 = vld [vmem:[#allocation2 + $0x78] sm:$0xff] }
  0xc1   :  { %v81_v42 = vld [vmem:[#allocation2 + $0xf8] sm:$0xff] }
  0xc2   :  { %1609 = vmatpush1.bf16.msra.mxu0 %v1608_v56  ;;  %v1628_v56 = vpack.c.bf16 %v426_v47, %v410_v46  ;;  %v62_v46 = vld [vmem:[#allocation2 + $0x60] sm:$0xff] }
  0xc3   :  { %1673 = vmatpush1.bf16.msra.mxu1 %v1672_v58  ;;  %1611 = vmatprep.subr.bf16.mxu0 %v1610_v59  ;;  %v1692_v58 = vpack.c.bf16 %v428_v50, %v412_v48  ;;  %v1630_v59 = vpack.c.bf16 %v459_v52, %v443_v51  ;;  %v78_v47 = vld [vmem:[#allocation2 + $0xe0] sm:$0xff]  ;;  %v64_v48 = vld [vmem:[#allocation2 + $0x70] sm:$0xff]  ;;  %v95_v51 = vld [vmem:[#allocation2 + $0x168] sm:$0xff] }
  0xc4   :  { %1675 = vmatprep.subr.bf16.mxu1 %v1674_v63  ;;  %v1694_v63 = vpack.c.bf16 %v461_v55, %v445_v54  ;;  %v80_v50 = vld [vmem:[#allocation2 + $0xf0] sm:$0xff]  ;;  %v111_v52 = vld [vmem:[#allocation2 + $0x1e8] sm:$0xff]  ;;  %v97_v54 = vld [vmem:[#allocation2 + $0x178] sm:$0xff] }
  0xc5   :  { %v113_v55 = vld [vmem:[#allocation2 + $0x1f8] sm:$0xff] }
  0xc6   :  { %1613 = vmatpush1.bf16.msra.mxu0 %v1612_v5  ;;  %v1632_v5 = vpack.c.bf16 %v458_v61, %v442_v60  ;;  %v94_v60 = vld [vmem:[#allocation2 + $0x160] sm:$0xff] }
  0xc7   :  { %1677 = vmatpush1.bf16.msra.mxu1 %v1676_v6  ;;  %1615 = vmatprep.subr.bf16.mxu0 %v1614_v7  ;;  %v1696_v6 = vpack.c.bf16 %v460_v0, %v444_v62  ;;  %v1634_v7 = vpack.c.bf16 %v491_v2, %v475_v1  ;;  %v110_v61 = vld [vmem:[#allocation2 + $0x1e0] sm:$0xff]  ;;  %v96_v62 = vld [vmem:[#allocation2 + $0x170] sm:$0xff]  ;;  %v127_v1 = vld [vmem:[#allocation2 + $0x268] sm:$0xff] }
  0xc8   :  { %1679 = vmatprep.subr.bf16.mxu1 %v1678_v11  ;;  %v1698_v11 = vpack.c.bf16 %v493_v4, %v477_v3  ;;  %v112_v0 = vld [vmem:[#allocation2 + $0x1f0] sm:$0xff]  ;;  %v143_v2 = vld [vmem:[#allocation2 + $0x2e8] sm:$0xff]  ;;  %v129_v3 = vld [vmem:[#allocation2 + $0x278] sm:$0xff] }
  0xc9   :  { %v145_v4 = vld [vmem:[#allocation2 + $0x2f8] sm:$0xff] }
  0xca   :  { %1617 = vmatpush1.bf16.msra.mxu0 %v1616_v17  ;;  %v1636_v17 = vpack.c.bf16 %v490_v9, %v474_v8  ;;  %v126_v8 = vld [vmem:[#allocation2 + $0x260] sm:$0xff] }
  0xcb   :  { %1681 = vmatpush1.bf16.msra.mxu1 %v1680_v18  ;;  %1619 = vmatprep.subr.bf16.mxu0 %v1618_v19  ;;  %v1700_v18 = vpack.c.bf16 %v492_v12, %v476_v10  ;;  %v1638_v19 = vpack.c.bf16 %v523_v14, %v507_v13  ;;  %v142_v9 = vld [vmem:[#allocation2 + $0x2e0] sm:$0xff]  ;;  %v128_v10 = vld [vmem:[#allocation2 + $0x270] sm:$0xff]  ;;  %v159_v13 = vld [vmem:[#allocation2 + $0x368] sm:$0xff] }
  0xcc   :  { %1683 = vmatprep.subr.bf16.mxu1 %v1682_v24  ;;  %v1702_v24 = vpack.c.bf16 %v525_v16, %v509_v15  ;;  %v144_v12 = vld [vmem:[#allocation2 + $0x2f0] sm:$0xff]  ;;  %v175_v14 = vld [vmem:[#allocation2 + $0x3e8] sm:$0xff]  ;;  %v161_v15 = vld [vmem:[#allocation2 + $0x378] sm:$0xff] }
  0xcd   :  { %v177_v16 = vld [vmem:[#allocation2 + $0x3f8] sm:$0xff] }
  0xce   :  { %1621 = vmatpush1.bf16.msra.mxu0 %v1620_v30  ;;  %v1640_v30 = vpack.c.bf16 %v522_v22, %v506_v20  ;;  %v158_v20 = vld [vmem:[#allocation2 + $0x360] sm:$0xff] }
  0xcf   :  { %1685 = vmatpush1.bf16.msra.mxu1 %v1684_v31  ;;  %1623 = vmatprep.subr.bf16.mxu0 %v1622_v32  ;;  %v1704_v31 = vpack.c.bf16 %v524_v25, %v508_v23  ;;  %v1642_v32 = vpack.c.bf16 %v555_v27, %v539_v26  ;;  %v174_v22 = vld [vmem:[#allocation2 + $0x3e0] sm:$0xff]  ;;  %v160_v23 = vld [vmem:[#allocation2 + $0x370] sm:$0xff]  ;;  %v191_v26 = vld [vmem:[#allocation2 + $0x468] sm:$0xff] }
  0xd0   :  { %1687 = vmatprep.subr.bf16.mxu1 %v1686_v36  ;;  %v1706_v36 = vpack.c.bf16 %v557_v29, %v541_v28  ;;  %v176_v25 = vld [vmem:[#allocation2 + $0x3f0] sm:$0xff]  ;;  %v207_v27 = vld [vmem:[#allocation2 + $0x4e8] sm:$0xff]  ;;  %v193_v28 = vld [vmem:[#allocation2 + $0x478] sm:$0xff] }
  0xd1   :  { %v209_v29 = vld [vmem:[#allocation2 + $0x4f8] sm:$0xff] }
  0xd2   :  { %1625 = vmatpush1.bf16.msra.mxu0 %v1624_v43  ;;  %v1644_v43 = vpack.c.bf16 %v554_v34, %v538_v33  ;;  %v206_v33 = vld [vmem:[#allocation2 + $0x4e0] sm:$0xff]  ;;  %v192_v34 = vld [vmem:[#allocation2 + $0x470] sm:$0xff] }
  0xd3   :  { %1689 = vmatpush1.bf16.msra.mxu1 %v1688_v44  ;;  %1627 = vmatprep.subr.bf16.mxu0 %v1626_v45  ;;  %v1708_v44 = vpack.c.bf16 %v556_v37, %v540_v35  ;;  %v1710_v45 = vpack.c.bf16 %v79_v40, %v63_v38  ;;  %v1790_v35 = vpack.c.bf16 %v209_v29, %v193_v28  ;;  %v223_v37 = vld [vmem:[#allocation2 + $0x568] sm:$0xff]  ;;  %v225_v40 = vld [vmem:[#allocation2 + $0x578] sm:$0xff] }
  0xd4   :  { %1691 = vmatprep.subr.bf16.mxu1 %v1690_v49  ;;  %v1774_v49 = vpack.c.bf16 %v81_v42, %v65_v41  ;;  %v239_v38 = vld [vmem:[#allocation2 + $0x5e8] sm:$0xff]  ;;  %v241_v41 = vld [vmem:[#allocation2 + $0x5f8] sm:$0xff] }
  0xd5   :  { %v369_v28 = vld [vmem:[#allocation2 + $0x9f8] sm:$0xff] }
  0xd6   :  { %1629 = vmatpush1.bf16.msra.mxu0 %v1628_v56  ;;  %v1712_v56 = vpack.c.bf16 %v78_v47, %v62_v46  ;;  %v238_v46 = vld [vmem:[#allocation2 + $0x5e0] sm:$0xff]  ;;  %v224_v47 = vld [vmem:[#allocation2 + $0x570] sm:$0xff] }
  0xd7   :  { %1693 = vmatpush1.bf16.msra.mxu1 %v1692_v58  ;;  %1631 = vmatprep.subr.bf16.mxu0 %v1630_v59  ;;  %v1776_v58 = vpack.c.bf16 %v80_v50, %v64_v48  ;;  %v1714_v59 = vpack.c.bf16 %v111_v52, %v95_v51  ;;  %v1794_v48 = vpack.c.bf16 %v241_v41, %v225_v40  ;;  %v255_v50 = vld [vmem:[#allocation2 + $0x668] sm:$0xff]  ;;  %v257_v52 = vld [vmem:[#allocation2 + $0x678] sm:$0xff] }
  0xd8   :  { %1695 = vmatprep.subr.bf16.mxu1 %v1694_v63  ;;  %v1778_v63 = vpack.c.bf16 %v113_v55, %v97_v54  ;;  %v271_v51 = vld [vmem:[#allocation2 + $0x6e8] sm:$0xff]  ;;  %v273_v54 = vld [vmem:[#allocation2 + $0x6f8] sm:$0xff] }
  0xd9   :  { %v401_v40 = vld [vmem:[#allocation2 + $0xaf8] sm:$0xff] }
  0xda   :  { %1633 = vmatpush1.bf16.msra.mxu0 %v1632_v5  ;;  %v1716_v5 = vpack.c.bf16 %v110_v61, %v94_v60  ;;  %v270_v60 = vld [vmem:[#allocation2 + $0x6e0] sm:$0xff]  ;;  %v256_v61 = vld [vmem:[#allocation2 + $0x670] sm:$0xff] }
  0xdb   :  { %1697 = vmatpush1.bf16.msra.mxu1 %v1696_v6  ;;  %1635 = vmatprep.subr.bf16.mxu0 %v1634_v7  ;;  %v1780_v6 = vpack.c.bf16 %v112_v0, %v96_v62  ;;  %v1718_v7 = vpack.c.bf16 %v143_v2, %v127_v1  ;;  %v1798_v62 = vpack.c.bf16 %v273_v54, %v257_v52  ;;  %v287_v0 = vld [vmem:[#allocation2 + $0x768] sm:$0xff]  ;;  %v289_v2 = vld [vmem:[#allocation2 + $0x778] sm:$0xff] }
  0xdc   :  { %1699 = vmatprep.subr.bf16.mxu1 %v1698_v11  ;;  %v1782_v11 = vpack.c.bf16 %v145_v4, %v129_v3  ;;  %v303_v1 = vld [vmem:[#allocation2 + $0x7e8] sm:$0xff]  ;;  %v305_v3 = vld [vmem:[#allocation2 + $0x7f8] sm:$0xff] }
  0xdd   :  { %v433_v52 = vld [vmem:[#allocation2 + $0xbf8] sm:$0xff] }
  0xde   :  { %1637 = vmatpush1.bf16.msra.mxu0 %v1636_v17  ;;  %v1720_v17 = vpack.c.bf16 %v142_v9, %v126_v8  ;;  %v302_v8 = vld [vmem:[#allocation2 + $0x7e0] sm:$0xff]  ;;  %v288_v9 = vld [vmem:[#allocation2 + $0x770] sm:$0xff] }
  0xdf   :  { %1701 = vmatpush1.bf16.msra.mxu1 %v1700_v18  ;;  %1639 = vmatprep.subr.bf16.mxu0 %v1638_v19  ;;  %v1784_v18 = vpack.c.bf16 %v144_v12, %v128_v10  ;;  %v1722_v19 = vpack.c.bf16 %v175_v14, %v159_v13  ;;  %v1802_v10 = vpack.c.bf16 %v305_v3, %v289_v2  ;;  %v319_v12 = vld [vmem:[#allocation2 + $0x868] sm:$0xff]  ;;  %v321_v14 = vld [vmem:[#allocation2 + $0x878] sm:$0xff] }
  0xe0   :  { %1703 = vmatprep.subr.bf16.mxu1 %v1702_v24  ;;  %v1786_v24 = vpack.c.bf16 %v177_v16, %v161_v15  ;;  %v335_v13 = vld [vmem:[#allocation2 + $0x8e8] sm:$0xff]  ;;  %v337_v15 = vld [vmem:[#allocation2 + $0x8f8] sm:$0xff] }
  0xe1   :  { %v465_v2 = vld [vmem:[#allocation2 + $0xcf8] sm:$0xff] }
  0xe2   :  { %1641 = vmatpush1.bf16.msra.mxu0 %v1640_v30  ;;  %v1724_v30 = vpack.c.bf16 %v174_v22, %v158_v20  ;;  %v334_v20 = vld [vmem:[#allocation2 + $0x8e0] sm:$0xff]  ;;  %v320_v22 = vld [vmem:[#allocation2 + $0x870] sm:$0xff] }
  0xe3   :  { %1705 = vmatpush1.bf16.msra.mxu1 %v1704_v31  ;;  %1643 = vmatprep.subr.bf16.mxu0 %v1642_v32  ;;  %v1726_v31 = vpack.c.bf16 %v207_v27, %v191_v26  ;;  %v190_v32 = vld [vmem:[#allocation2 + $0x460] sm:$0xff]  ;;  %v367_v26 = vld [vmem:[#allocation2 + $0x9e8] sm:$0xff]  ;;  %v353_v27 = vld [vmem:[#allocation2 + $0x978] sm:$0xff] }
  0xe4   :  { %1707 = vmatprep.subr.bf16.mxu1 %v1706_v36  ;;  %v208_v36 = vld [vmem:[#allocation2 + $0x4f0] sm:$0xff]  ;;  %v1728_v42 = vpack.c.bf16 %v206_v33, %v190_v32  ;;  %v366_v32 = vld [vmem:[#allocation2 + $0x9e0] sm:$0xff] }
  0xe5   :  { %v352_v33 = vld [vmem:[#allocation2 + $0x970] sm:$0xff] }
  0xe6   :  { %1645 = vmatpush1.bf16.msra.mxu0 %v1644_v43  ;;  %v1792_v43 = vpack.c.bf16 %v208_v36, %v192_v34  ;;  %v1810_v34 = vpack.c.bf16 %v369_v28, %v353_v27  ;;  %v383_v36 = vld [vmem:[#allocation2 + $0xa68] sm:$0xff]  ;;  %v529_v27 = vld [vmem:[#allocation2 + $0xef8] sm:$0xff] }
  0xe7   :  { %1709 = vmatpush1.bf16.msra.mxu1 %v1708_v44  ;;  %1711 = vmatprep.subr.bf16.mxu0 %v1710_v45  ;;  %v1730_v44 = vpack.c.bf16 %v239_v38, %v223_v37  ;;  %v222_v45 = vld [vmem:[#allocation2 + $0x560] sm:$0xff]  ;;  %v399_v37 = vld [vmem:[#allocation2 + $0xae8] sm:$0xff]  ;;  %v385_v38 = vld [vmem:[#allocation2 + $0xa78] sm:$0xff] }
  0xe8   :  { %1775 = vmatprep.subr.bf16.mxu1 %v1774_v49  ;;  %v240_v49 = vld [vmem:[#allocation2 + $0x5f0] sm:$0xff]  ;;  %v1732_v55 = vpack.c.bf16 %v238_v46, %v222_v45  ;;  %v398_v45 = vld [vmem:[#allocation2 + $0xae0] sm:$0xff] }
  0xe9   :  { %1006 = vmatmul.mubr.f32.vlgmr.msra.gmra.mrb[4].mxu0 %v1958_v53  ;;  %v384_v46 = vld [vmem:[#allocation2 + $0xa70] sm:$0xff] }
  0xea   :  { %1077 = vmatmul.mubr.f32.vlgmr.msra.gmra.mrb[4].mxu1 %v1958_v53  ;;  %1713 = vmatpush1.bf16.msra.mxu0 %v1712_v56  ;;  %v1796_v56 = vpack.c.bf16 %v240_v49, %v224_v47  ;;  %v1814_v47 = vpack.c.bf16 %v401_v40, %v385_v38  ;;  %v415_v49 = vld [vmem:[#allocation2 + $0xb68] sm:$0xff]  ;;  %v561_v38 = vld [vmem:[#allocation2 + $0xff8] sm:$0xff] }
  0xeb   :  { %1777 = vmatpush1.bf16.msra.mxu1 %v1776_v58  ;;  %1715 = vmatprep.subr.bf16.mxu0 %v1714_v59  ;;  %v1734_v58 = vpack.c.bf16 %v271_v51, %v255_v50  ;;  %v254_v59 = vld [vmem:[#allocation2 + $0x660] sm:$0xff]  ;;  %v431_v50 = vld [vmem:[#allocation2 + $0xbe8] sm:$0xff]  ;;  %v417_v51 = vld [vmem:[#allocation2 + $0xb78] sm:$0xff] }
  0xec   :  { %1779 = vmatprep.subr.bf16.mxu1 %v1778_v63  ;;  %1147 = vmatprep.mubr.f32.mxu0 %v1962_v57  ;;  %v272_v63 = vld [vmem:[#allocation2 + $0x6f0] sm:$0xff]  ;;  %v1736_v4 = vpack.c.bf16 %v270_v60, %v254_v59  ;;  %v430_v59 = vld [vmem:[#allocation2 + $0xbe0] sm:$0xff] }
  0xed   :  { %1218 = vmatprep.mubr.f32.mxu1 %v1962_v57  ;;  %v1788_v57 = vpack.c.bf16 %v176_v25, %v160_v23  ;;  %v1806_v23 = vpack.c.bf16 %v337_v15, %v321_v14  ;;  %v351_v25 = vld [vmem:[#allocation2 + $0x968] sm:$0xff]  ;;  %v416_v60 = vld [vmem:[#allocation2 + $0xb70] sm:$0xff]  ;;  %v497_v14 = vld [vmem:[#allocation2 + $0xdf8] sm:$0xff] }
  0xee   :  { %1717 = vmatpush1.bf16.msra.mxu0 %v1716_v5  ;;  %v1800_v5 = vpack.c.bf16 %v272_v63, %v256_v61  ;;  %v1818_v61 = vpack.c.bf16 %v433_v52, %v417_v51  ;;  %v447_v63 = vld [vmem:[#allocation2 + $0xc68] sm:$0xff]  ;;  %v562_v51 = vld [vmem:[#allocation4] sm:$0xff]  ;;  %v576_v52 = vsub.s32 2, %v1943_v21 }
  0xef   :  { %1781 = vmatpush1.bf16.msra.mxu1 %v1780_v6  ;;  %1719 = vmatprep.subr.bf16.mxu0 %v1718_v7  ;;  %v1738_v6 = vpack.c.bf16 %v303_v1, %v287_v0  ;;  %v286_v7 = vld [vmem:[#allocation2 + $0x760] sm:$0xff]  ;;  %v463_v0 = vld [vmem:[#allocation2 + $0xce8] sm:$0xff]  ;;  %v449_v1 = vld [vmem:[#allocation2 + $0xc78] sm:$0xff] }
  0xf0   :  { %1783 = vmatprep.subr.bf16.mxu1 %v1782_v11  ;;  %v304_v11 = vld [vmem:[#allocation2 + $0x7f0] sm:$0xff]  ;;  %v1740_v16 = vpack.c.bf16 %v302_v8, %v286_v7  ;;  %v462_v7 = vld [vmem:[#allocation2 + $0xce0] sm:$0xff] }
  0xf1   :  { %v448_v8 = vld [vmem:[#allocation2 + $0xc70] sm:$0xff] }
  0xf2   :  { %1721 = vmatpush1.bf16.msra.mxu0 %v1720_v17  ;;  %v1804_v17 = vpack.c.bf16 %v304_v11, %v288_v9  ;;  %v1822_v9 = vpack.c.bf16 %v465_v2, %v449_v1  ;;  %v479_v11 = vld [vmem:[#allocation2 + $0xd68] sm:$0xff] }
  0xf3   :  { %1785 = vmatpush1.bf16.msra.mxu1 %v1784_v18  ;;  %1723 = vmatprep.subr.bf16.mxu0 %v1722_v19  ;;  %v1742_v18 = vpack.c.bf16 %v335_v13, %v319_v12  ;;  %v318_v19 = vld [vmem:[#allocation2 + $0x860] sm:$0xff]  ;;  %v495_v12 = vld [vmem:[#allocation2 + $0xde8] sm:$0xff]  ;;  %v481_v13 = vld [vmem:[#allocation2 + $0xd78] sm:$0xff] }
  0xf4   :  { %1787 = vmatprep.subr.bf16.mxu1 %v1786_v24  ;;  %v336_v24 = vld [vmem:[#allocation2 + $0x8f0] sm:$0xff]  ;;  %v1744_v29 = vpack.c.bf16 %v334_v20, %v318_v19  ;;  %v494_v19 = vld [vmem:[#allocation2 + $0xde0] sm:$0xff] }
  0xf5   :  { %v480_v20 = vld [vmem:[#allocation2 + $0xd70] sm:$0xff] }
  0xf6   :  { %1725 = vmatpush1.bf16.msra.mxu0 %v1724_v30  ;;  %v1808_v30 = vpack.c.bf16 %v336_v24, %v320_v22  ;;  %v1826_v22 = vpack.c.bf16 %v497_v14, %v481_v13  ;;  %v511_v24 = vld [vmem:[#allocation2 + $0xe68] sm:$0xff] }
  0xf7   :  { %1789 = vmatpush1.bf16.msra.mxu1 %v1788_v57  ;;  %1727 = vmatprep.subr.bf16.mxu0 %v1726_v31  ;;  %v1746_v57 = vpack.c.bf16 %v367_v26, %v351_v25  ;;  %v350_v31 = vld [vmem:[#allocation2 + $0x960] sm:$0xff]  ;;  %v527_v25 = vld [vmem:[#allocation2 + $0xee8] sm:$0xff]  ;;  %v513_v26 = vld [vmem:[#allocation2 + $0xe78] sm:$0xff] }
  0xf8   :  { %1791 = vmatprep.subr.bf16.mxu1 %v1790_v35  ;;  %v368_v35 = vld [vmem:[#allocation2 + $0x9f0] sm:$0xff]  ;;  %v1748_v41 = vpack.c.bf16 %v366_v32, %v350_v31  ;;  %v526_v31 = vld [vmem:[#allocation2 + $0xee0] sm:$0xff] }
  0xf9   :  { %v512_v32 = vld [vmem:[#allocation2 + $0xe70] sm:$0xff] }
  0xfa   :  { %1729 = vmatpush1.bf16.msra.mxu0 %v1728_v42  ;;  %v1812_v42 = vpack.c.bf16 %v368_v35, %v352_v33  ;;  %v1830_v33 = vpack.c.bf16 %v529_v27, %v513_v26  ;;  %v543_v35 = vld [vmem:[#allocation2 + $0xf68] sm:$0xff] }
  0xfb   :  { %1793 = vmatpush1.bf16.msra.mxu1 %v1792_v43  ;;  %1731 = vmatprep.subr.bf16.mxu0 %v1730_v44  ;;  %v1750_v43 = vpack.c.bf16 %v399_v37, %v383_v36  ;;  %v382_v44 = vld [vmem:[#allocation2 + $0xa60] sm:$0xff]  ;;  %v559_v36 = vld [vmem:[#allocation2 + $0xfe8] sm:$0xff]  ;;  %v545_v37 = vld [vmem:[#allocation2 + $0xf78] sm:$0xff] }
  0xfc   :  { %1795 = vmatprep.subr.bf16.mxu1 %v1794_v48  ;;  %v400_v48 = vld [vmem:[#allocation2 + $0xaf0] sm:$0xff]  ;;  %v1752_v54 = vpack.c.bf16 %v398_v45, %v382_v44  ;;  %v558_v44 = vld [vmem:[#allocation2 + $0xfe0] sm:$0xff]  ;;  %v1834_v45 = vpack.c.bf16 %v561_v38, %v545_v37 }
  0xfe   :  { %1733 = vmatpush1.bf16.msra.mxu0 %v1732_v55  ;;  %v1816_v55 = vpack.c.bf16 %v400_v48, %v384_v46  ;;  %v544_v46 = vld [vmem:[#allocation2 + $0xf70] sm:$0xff] }
  0xff   :  { %1797 = vmatpush1.bf16.msra.mxu1 %v1796_v56  ;;  %1735 = vmatprep.subr.bf16.mxu0 %v1734_v58  ;;  %v1754_v56 = vpack.c.bf16 %v431_v50, %v415_v49  ;;  %v414_v58 = vld [vmem:[#allocation2 + $0xb60] sm:$0xff]  ;;  %v568_v50 = vsub.s32 0, %v1943_v21 }
 0x100   :  { %1799 = vmatprep.subr.bf16.mxu1 %v1798_v62  ;;  %v432_v62 = vld [vmem:[#allocation2 + $0xbf0] sm:$0xff]  ;;  %v1756_v3 = vpack.c.bf16 %v430_v59, %v414_v58  ;;  %v577_v58 = vrot.slane %v562_v51, %v576_v52 }
 0x102   :  { %1737 = vmatpush1.bf16.msra.mxu0 %v1736_v4  ;;  %v1820_v4 = vpack.c.bf16 %v432_v62, %v416_v60 }
 0x103   :  { %1801 = vmatpush1.bf16.msra.mxu1 %v1800_v5  ;;  %1739 = vmatprep.subr.bf16.mxu0 %v1738_v6  ;;  %v1758_v5 = vpack.c.bf16 %v463_v0, %v447_v63  ;;  %v446_v6 = vld [vmem:[#allocation2 + $0xc60] sm:$0xff] }
 0x104   :  { %1803 = vmatprep.subr.bf16.mxu1 %v1802_v10  ;;  %v464_v10 = vld [vmem:[#allocation2 + $0xcf0] sm:$0xff]  ;;  %v1760_v15 = vpack.c.bf16 %v462_v7, %v446_v6 }
 0x106   :  { %1741 = vmatpush1.bf16.msra.mxu0 %v1740_v16  ;;  %v1824_v16 = vpack.c.bf16 %v464_v10, %v448_v8  ;;  %v592_v10 = vsub.s32 6, %v1943_v21 }
 0x107   :  { %1805 = vmatpush1.bf16.msra.mxu1 %v1804_v17  ;;  %1743 = vmatprep.subr.bf16.mxu0 %v1742_v18  ;;  %v1762_v17 = vpack.c.bf16 %v495_v12, %v479_v11  ;;  %v478_v18 = vld [vmem:[#allocation2 + $0xd60] sm:$0xff]  ;;  %v588_v11 = vsub.s32 5, %v1943_v21  ;;  %v596_v12 = vsub.s32 7, %v1943_v21 }
 0x108   :  { %1807 = vmatprep.subr.bf16.mxu1 %v1806_v23  ;;  %v496_v23 = vld [vmem:[#allocation2 + $0xdf0] sm:$0xff]  ;;  %v1764_v28 = vpack.c.bf16 %v494_v19, %v478_v18  ;;  %v593_v14 = vrot.slane %v562_v51, %v592_v10 }
 0x10a   :  { %1745 = vmatpush1.bf16.msra.mxu0 %v1744_v29  ;;  %v1828_v29 = vpack.c.bf16 %v496_v23, %v480_v20 }
 0x10b   :  { %1809 = vmatpush1.bf16.msra.mxu1 %v1808_v30  ;;  %1747 = vmatprep.subr.bf16.mxu0 %v1746_v57  ;;  %v1766_v30 = vpack.c.bf16 %v527_v25, %v511_v24  ;;  %v510_v57 = vld [vmem:[#allocation2 + $0xe60] sm:$0xff] }
 0x10c   :  { %1811 = vmatprep.subr.bf16.mxu1 %v1810_v34  ;;  %v528_v34 = vld [vmem:[#allocation2 + $0xef0] sm:$0xff]  ;;  %v1768_v40 = vpack.c.bf16 %v526_v31, %v510_v57 }
 0x10e   :  { %1749 = vmatpush1.bf16.msra.mxu0 %v1748_v41  ;;  %v1832_v41 = vpack.c.bf16 %v528_v34, %v512_v32 }
 0x10f   :  { %1813 = vmatpush1.bf16.msra.mxu1 %v1812_v42  ;;  %1751 = vmatprep.subr.bf16.mxu0 %v1750_v43  ;;  %v1770_v42 = vpack.c.bf16 %v559_v36, %v543_v35  ;;  %v542_v43 = vld [vmem:[#allocation2 + $0xf60] sm:$0xff] }
 0x110   :  { %1815 = vmatprep.subr.bf16.mxu1 %v1814_v47  ;;  %v560_v47 = vld [vmem:[#allocation2 + $0xff0] sm:$0xff]  ;;  %v1772_v48 = vpack.c.bf16 %v558_v44, %v542_v43 }
 0x111   :  { %v1836_v49 = vpack.c.bf16 %v560_v47, %v544_v46 }
 0x112   :  { %1753 = vmatpush1.bf16.msra.mxu0 %v1752_v54  ;;  %v572_v54 = vsub.s32 1, %v1943_v21 }
 0x113   :  { %1817 = vmatpush1.bf16.msra.mxu1 %v1816_v55  ;;  %1755 = vmatprep.subr.bf16.mxu0 %v1754_v56  ;;  %v580_v55 = vsub.s32 3, %v1943_v21  ;;  %v569_v56 = vrot.slane %v562_v51, %v568_v50 }
 0x114   :  { %1819 = vmatprep.subr.bf16.mxu1 %v1818_v61  ;;  %v573_v59 = vrot.slane %v562_v51, %v572_v54 }
 0x115   :  { %v581_v60 = vrot.slane %v562_v51, %v580_v55 }
 0x116   :  { %1757 = vmatpush1.bf16.msra.mxu0 %v1756_v3 }
 0x117   :  { %1821 = vmatpush1.bf16.msra.mxu1 %v1820_v4  ;;  %1759 = vmatprep.subr.bf16.mxu0 %v1758_v5 }
 0x118   :  { %1823 = vmatprep.subr.bf16.mxu1 %v1822_v9  ;;  %v584_v9 = vsub.s32 4, %v1943_v21  ;;  %v563_v21 = vld [vmem:[#allocation4 + $0x8] sm:$0xff] }
 0x119   :  { %v601_v57 = vrot.slane %v563_v21, %v568_v50  ;;  %v609_v31 = vrot.slane %v563_v21, %v576_v52  ;;  %v605_v32 = vrot.slane %v563_v21, %v572_v54  ;;  %v621_v50 = vrot.slane %v563_v21, %v588_v11 }
 0x11a   :  { %1761 = vmatpush1.bf16.msra.mxu0 %v1760_v15  ;;  %v585_v13 = vrot.slane %v562_v51, %v584_v9  ;;  %v589_v15 = vrot.slane %v562_v51, %v588_v11 }
 0x11b   :  { %1825 = vmatpush1.bf16.msra.mxu1 %v1824_v16  ;;  %1763 = vmatprep.subr.bf16.mxu0 %v1762_v17  ;;  %v597_v16 = vrot.slane %v562_v51, %v596_v12  ;;  %v629_v51 = vrot.slane %v563_v21, %v596_v12 }
 0x11c   :  { %1827 = vmatprep.subr.bf16.mxu1 %v1826_v22 }
 0x11e   :  { %1765 = vmatpush1.bf16.msra.mxu0 %v1764_v28 }
 0x11f   :  { %1829 = vmatpush1.bf16.msra.mxu1 %v1828_v29  ;;  %1767 = vmatprep.subr.bf16.mxu0 %v1766_v30 }
 0x120   :  { %1831 = vmatprep.subr.bf16.mxu1 %v1830_v33  ;;  %v613_v33 = vrot.slane %v563_v21, %v580_v55 }
 0x122   :  { %1769 = vmatpush1.bf16.msra.mxu0 %v1768_v40 }
 0x123   :  { %1833 = vmatpush1.bf16.msra.mxu1 %v1832_v41  ;;  %1771 = vmatprep.subr.bf16.mxu0 %v1770_v42 }
 0x124   :  { %1835 = vmatprep.subr.bf16.mxu1 %v1834_v45 }
 0x126   :  { %1773 = vmatpush1.bf16.msra.mxu0 %v1772_v48  ;;  %v617_v48 = vrot.slane %v563_v21, %v584_v9 }
 0x127   :  { %1837 = vmatpush1.bf16.msra.mxu1 %v1836_v49  ;;  %v625_v49 = vrot.slane %v563_v21, %v592_v10 }
 0x129   :  { %1148 = vmatmul.mubr.f32.vlgmr.msra.gmra.mrb[6].mxu0 %v1958_v53 }
 0x12a   :  { %1219 = vmatmul.mubr.f32.vlgmr.msra.gmra.mrb[6].mxu1 %v1958_v53 }
 0x13c   :  { %v723_v61 = vpop.f32.mrb[0].mxu0 }
 0x13d   :  { %v724_v62 = vadd.f32 %v723_v61, %v569_v56  ;;  %v794_v63 = vpop.f32.mrb[0].mxu1  ;;  %v725_v0 = vpop.f32.mrb[1].mxu0 }
 0x13e   :  { %v795_v1 = vadd.f32 %v794_v63, %v577_v58  ;;  %v726_v2 = vadd.f32 %v725_v0, %v573_v59  ;;  %v796_v53 = vpop.f32.mrb[1].mxu1 }
 0x13f   :  { %v797_v3 = vadd.f32 %v796_v53, %v581_v60 }
 0x140   :  { %v1241_v4 = vcombine.low %v724_v62, %v726_v2 }
 0x141   :  { %v1242_v5 = vcombine.low %v795_v1, %v797_v3 }
 0x142   :  { %v1249_v6 = vrot.slane %v1241_v4, %v1955_v39 }
 0x143   :  { %v1256_v7 = vrot.slane %v1242_v5, %v1955_v39 }
 0x145   :  { %v1257_v8 = vcombine.low %v1249_v6, %v1256_v7 }
 0x147   :  { %1313 = vst [vmem:[%s2011_s3] sm:$0xff] %v1257_v8 }
 0x17c   :  { %v865_v17 = vpop.f32.mrb[2].mxu0 }
 0x17d   :  { %v866_v18 = vadd.f32 %v865_v17, %v585_v13  ;;  %v936_v19 = vpop.f32.mrb[2].mxu1  ;;  %v867_v20 = vpop.f32.mrb[3].mxu0 }
 0x17e   :  { %v937_v22 = vadd.f32 %v936_v19, %v593_v14  ;;  %v868_v23 = vadd.f32 %v867_v20, %v589_v15  ;;  %v938_v24 = vpop.f32.mrb[3].mxu1 }
 0x17f   :  { %v939_v25 = vadd.f32 %v938_v24, %v597_v16 }
 0x180   :  { %v1258_v26 = vcombine.low %v866_v18, %v868_v23 }
 0x181   :  { %v1259_v27 = vcombine.low %v937_v22, %v939_v25 }
 0x182   :  { %v1266_v28 = vrot.slane %v1258_v26, %v1955_v39 }
 0x183   :  { %v1273_v29 = vrot.slane %v1259_v27, %v1955_v39 }
 0x185   :  { %v1274_v30 = vcombine.low %v1266_v28, %v1273_v29 }
 0x187   :  { %1314 = vst [vmem:[%s2011_s3 + $0x8] sm:$0xff] %v1274_v30 }
 0x1bc   :  { %v1007_v34 = vpop.f32.mrb[4].mxu0 }
 0x1bd   :  { %v1008_v35 = vadd.f32 %v1007_v34, %v601_v57  ;;  %v1078_v36 = vpop.f32.mrb[4].mxu1  ;;  %v1009_v37 = vpop.f32.mrb[5].mxu0 }
 0x1be   :  { %v1079_v38 = vadd.f32 %v1078_v36, %v609_v31  ;;  %v1010_v40 = vadd.f32 %v1009_v37, %v605_v32  ;;  %v1080_v41 = vpop.f32.mrb[5].mxu1 }
 0x1bf   :  { %v1081_v42 = vadd.f32 %v1080_v41, %v613_v33 }
 0x1c0   :  { %v1275_v43 = vcombine.low %v1008_v35, %v1010_v40 }
 0x1c1   :  { %v1276_v44 = vcombine.low %v1079_v38, %v1081_v42 }
 0x1c2   :  { %v1283_v45 = vrot.slane %v1275_v43, %v1955_v39 }
 0x1c3   :  { %v1290_v46 = vrot.slane %v1276_v44, %v1955_v39 }
 0x1c5   :  { %v1291_v47 = vcombine.low %v1283_v45, %v1290_v46 }
 0x1c7   :  { %1315 = vst [vmem:[%s2011_s3 + $0x10] sm:$0xff] %v1291_v47 }
 0x1fc   :  { %v1149_v52 = vpop.f32.mrb[6].mxu0 }
 0x1fd   :  { %v1150_v54 = vadd.f32 %v1149_v52, %v617_v48  ;;  %v1220_v55 = vpop.f32.mrb[6].mxu1  ;;  %v1151_v56 = vpop.f32.mrb[7].mxu0 }
 0x1fe   :  { %v1221_v58 = vadd.f32 %v1220_v55, %v625_v49  ;;  %v1152_v59 = vadd.f32 %v1151_v56, %v621_v50  ;;  %v1222_v60 = vpop.f32.mrb[7].mxu1 }
 0x1ff   :  { %v1223_v61 = vadd.f32 %v1222_v60, %v629_v51 }
 0x200   :  { %v1292_v62 = vcombine.low %v1150_v54, %v1152_v59 }
 0x201   :  { %v1293_v63 = vcombine.low %v1221_v58, %v1223_v61 }
 0x202   :  { %v1300_v0 = vrot.slane %v1292_v62, %v1955_v39 }
 0x203   :  { %v1307_v1 = vrot.slane %v1293_v63, %v1955_v39 }
 0x205   :  { %v1308_v2 = vcombine.low %v1300_v0, %v1307_v1 }
 0x207   :  { %1316 = vst [vmem:[%s2011_s3 + $0x18] sm:$0xff] %v1308_v2 }
 0x208   :  { %1321 = vsyncpa [#allocation3], 1 }
 0x209   :  { %1322 = vsyncpa [#allocation5], 1 }

</bundles_post_ra>
